<compile_context>
chip_gen: v7x
topology: tpu7x:2x2x1
jax: 0.10.0
libtpu: 0.0.40
codegen_flags: <defaults>
</compile_context>

<pallas_src>
import jax
import jax.numpy as jnp
from jax.experimental import pallas as pl
from jax.experimental.pallas import tpu as pltpu


def _expert_tile_kernel(te_ref, tv_ref,                 # scalar prefetch (SMEM)
                        xs_ref, base_ref, rw_ref,       # gathered per-tile activations
                        agu_ref, bgu_ref, ad_ref, bd_ref,  # per-expert low-rank factors
                        wd_ref,                         # shared down_proj (resident)
                        out_ref):
    """One grid step = one token tile belonging to exactly one expert."""
    i = pl.program_id(0)
    inter = base_ref.shape[-1] // 2                     # I (static)

    @pl.when(tv_ref[i] != 0)
    def _():
        x = xs_ref[...]                                                  # (TM, H) bf16
        # fused low-rank A projection (gate|up) for this tile's expert
        xa = jnp.dot(x, agu_ref[...],
                     preferred_element_type=jnp.float32).astype(jnp.bfloat16)  # (TM, 2R)
        # base gate|up (precomputed in glue) + block-diagonal B correction
        gu = base_ref[...].astype(jnp.float32) + jnp.dot(
            xa, bgu_ref[...], preferred_element_type=jnp.float32)       # (TM, 2I) f32
        gate = gu[:, :inter]
        up = gu[:, inter:]
        # silu(gate) * up ; sigmoid via exp (EUP) + approx reciprocal (EUP slot)
        sig = pl.reciprocal(1.0 + jnp.exp(-gate), approx=True)
        # fold routing weight into h: the down path is linear in h, so this is
        # algebraically identical and avoids a (TM,H) broadcast multiply.
        h = (gate * sig * up * rw_ref[...]).astype(jnp.bfloat16)        # (TM, I)
        # shared down_proj + per-expert low-rank down correction
        down = jnp.dot(h, wd_ref[...], preferred_element_type=jnp.float32)
        h_a = jnp.dot(h, ad_ref[...],
                      preferred_element_type=jnp.float32).astype(jnp.bfloat16)
        down = down + jnp.dot(h_a, bd_ref[...], preferred_element_type=jnp.float32)
        out_ref[...] = down.astype(out_ref.dtype)                       # lane-dense vst

    @pl.when(tv_ref[i] == 0)
    def _():
        # pure-padding tile (rows map to the dummy token and are dropped)
        out_ref[...] = jnp.zeros_like(out_ref)


def moe_block_forward(params, hidden_states, *, top_k, norm_topk_prob,
                      experts_to_drop=None, tm=128):
    B, S, H = hidden_states.shape
    T = B * S
    dtype = hidden_states.dtype
    x = hidden_states.reshape(T, H)

    router_w = params["router_w"]
    E = router_w.shape[1]
    I = params["wg"].shape[1]
    R = params["ag"].shape[2]

    # ---------------- router (tiny; glue) ----------------
    router_logits = jnp.dot(x.astype(jnp.float32), router_w.astype(jnp.float32))
    if experts_to_drop is not None and len(tuple(experts_to_drop)) > 0:
        drop = jnp.zeros((E,), bool).at[
            jnp.asarray(tuple(experts_to_drop))].set(True)
        router_logits = jnp.where(drop[None, :], -jnp.inf, router_logits)
    routing = jax.nn.softmax(router_logits, axis=-1)
    k = min(top_k, E)
    topw, topi = jax.lax.top_k(routing, k)
    if norm_topk_prob:
        topw = topw / jnp.sum(topw, axis=-1, keepdims=True)
    topw = topw.astype(dtype)

    # ------- shared basenet gate|up projection: ONE fused GEMM over tokens -------
    xb = x.astype(jnp.bfloat16)
    wgu = jnp.concatenate([params["wg"], params["wu"]], axis=1)          # (H, 2I)
    base = jnp.dot(xb, wgu,
                   preferred_element_type=jnp.float32).astype(jnp.bfloat16)  # (T, 2I)

    # ------- group (token, expert) assignments by expert (megablocks-style) -------
    A = T * k
    flat_e = topi.reshape(A).astype(jnp.int32)
    flat_t = jnp.arange(A, dtype=jnp.int32) // k
    flat_w = topw.reshape(A).astype(jnp.float32)

    order = jnp.argsort(flat_e)                     # stable; groups by expert
    se = flat_e[order]
    st = flat_t[order]
    sw = flat_w[order]

    counts = jnp.bincount(flat_e, length=E)                              # (E,)
    padded_counts = ((counts + tm - 1) // tm) * tm
    group_start = jnp.cumsum(counts) - counts
    pad_start = jnp.cumsum(padded_counts) - padded_counts
    pad_end = jnp.cumsum(padded_counts)
    padded_pos = pad_start[se] + (jnp.arange(A, dtype=jnp.int32) - group_start[se])

    # static worst-case padded length / tile count (shapes must be static)
    L = ((A + E * (tm - 1) + tm - 1) // tm) * tm
    n_tiles = L // tm

    tok_pad = jnp.full((L,), T, dtype=jnp.int32).at[padded_pos].set(st)  # dummy=T
    rw_pad = jnp.zeros((L, 1), jnp.float32).at[padded_pos, 0].set(sw)

    x_ext = jnp.concatenate([xb, jnp.zeros((1, H), jnp.bfloat16)], axis=0)
    base_ext = jnp.concatenate([base, jnp.zeros((1, 2 * I), jnp.bfloat16)], axis=0)
    xs_pad = x_ext[tok_pad]                                              # (L, H)
    base_pad = base_ext[tok_pad]                                         # (L, 2I)

    tile_starts = jnp.arange(n_tiles, dtype=jnp.int32) * tm
    tile_expert = jnp.clip(
        jnp.sum(tile_starts[:, None] >= pad_end[None, :], axis=-1), 0, E - 1
    ).astype(jnp.int32)
    tile_valid = (tile_starts < pad_end[-1]).astype(jnp.int32)

    # ------- fused per-expert low-rank factors (would be pre-fused offline) -------
    agu = jnp.concatenate([params["ag"], params["au"]], axis=2)          # (E, H, 2R)
    bgu = jnp.zeros((E, 2 * R, 2 * I), jnp.bfloat16)
    bgu = bgu.at[:, :R, :I].set(params["bg"]).at[:, R:, I:].set(params["bu"])

    # ------- grouped expert-MLP kernel -------
    grid_spec = pltpu.PrefetchScalarGridSpec(
        num_scalar_prefetch=2,
        grid=(n_tiles,),
        in_specs=[
            pl.BlockSpec((tm, H), lambda i, te, tv: (i, 0)),             # x rows
            pl.BlockSpec((tm, 2 * I), lambda i, te, tv: (i, 0)),         # base gate|up
            pl.BlockSpec((tm, 1), lambda i, te, tv: (i, 0)),             # routing w
            pl.BlockSpec((pl.Squeezed(), H, 2 * R),
                         lambda i, te, tv: (te[i], 0, 0)),               # A (gate|up)
            pl.BlockSpec((pl.Squeezed(), 2 * R, 2 * I),
                         lambda i, te, tv: (te[i], 0, 0)),               # B block-diag
            pl.BlockSpec((pl.Squeezed(), I, R),
                         lambda i, te, tv: (te[i], 0, 0)),               # down_lora_A
            pl.BlockSpec((pl.Squeezed(), R, H),
                         lambda i, te, tv: (te[i], 0, 0)),               # down_lora_B
            pl.BlockSpec((I, H), lambda i, te, tv: (0, 0)),              # shared down
        ],
        out_specs=pl.BlockSpec((tm, H), lambda i, te, tv: (i, 0)),
    )
    out_pad = pl.pallas_call(
        _expert_tile_kernel,
        out_shape=jax.ShapeDtypeStruct((L, H), jnp.float32),
        grid_spec=grid_spec,
        compiler_params=pltpu.CompilerParams(
            dimension_semantics=("parallel",),
            vmem_limit_bytes=48 * 1024 * 1024),
    )(tile_expert, tile_valid,
      xs_pad, base_pad, rw_pad, agu, bgu, params["ad"], params["bd"], params["wd"])

    # ------- un-permute: scatter-add per-assignment outputs back to tokens -------
    final = jnp.zeros((T + 1, H), jnp.float32).at[tok_pad].add(out_pad)
    final = final[:T].astype(dtype).reshape(B, S, H)
    return final, router_logits


def _reference(params, hidden_states, *, top_k, norm_topk_prob,
               experts_to_drop=None):
    """Pure-JAX reference mirroring the PyTorch forward (dense formulation)."""
    B, S, H = hidden_states.shape
    T = B * S
    dtype = hidden_states.dtype
    x = hidden_states.reshape(T, H)
    E = params["router_w"].shape[1]

    router_logits = jnp.dot(x.astype(jnp.float32),
                            params["router_w"].astype(jnp.float32))
    if experts_to_drop is not None and len(tuple(experts_to_drop)) > 0:
        drop = jnp.zeros((E,), bool).at[
            jnp.asarray(tuple(experts_to_drop))].set(True)
        router_logits = jnp.where(drop[None, :], -jnp.inf, router_logits)
    routing = jax.nn.softmax(router_logits, axis=-1)
    k = min(top_k, E)
    topw, topi = jax.lax.top_k(routing, k)
    if norm_topk_prob:
        topw = topw / jnp.sum(topw, axis=-1, keepdims=True)
    topw = topw.astype(dtype)
    rw = jnp.zeros((T, E), dtype).at[jnp.arange(T)[:, None], topi].set(topw)

    f32 = lambda a: a.astype(jnp.float32)
    xb = f32(x.astype(jnp.bfloat16))
    out = jnp.zeros((T, H), jnp.float32)
    for e in range(E):
        gate = xb @ f32(params["wg"]) + (xb @ f32(params["ag"][e])) @ f32(params["bg"][e])
        up = xb @ f32(params["wu"]) + (xb @ f32(params["au"][e])) @ f32(params["bu"][e])
        h = jax.nn.silu(gate) * up
        down = h @ f32(params["wd"]) + (h @ f32(params["ad"][e])) @ f32(params["bd"][e])
        out = out + down * f32(rw[:, e:e + 1])
    return out.astype(dtype).reshape(B, S, H), router_logits


def init_params(key, *, hidden, intermediate, rank, num_experts):
    ks = jax.random.split(key, 10)

    def n(k, shape, scale=0.05, dt=jnp.bfloat16):
        return (scale * jax.random.normal(k, shape, dtype=jnp.float32)).astype(dt)

    return {
        # router stays f32 (tiny, computed in glue)
        "router_w": n(ks[0], (hidden, num_experts), dt=jnp.float32),
        # shared basenet (bf16 on the MXU, f32 accumulation)
        "wg": n(ks[1], (hidden, intermediate)),
        "wu": n(ks[2], (hidden, intermediate)),
        "wd": n(ks[3], (intermediate, hidden)),
        # per-expert SVD / LoRA factors
        "ag": n(ks[4], (num_experts, hidden, rank)),
        "bg": n(ks[5], (num_experts, rank, intermediate)),
        "au": n(ks[6], (num_experts, hidden, rank)),
        "bu": n(ks[7], (num_experts, rank, intermediate)),
        "ad": n(ks[8], (num_experts, intermediate, rank)),
        "bd": n(ks[9], (num_experts, rank, hidden)),
    }


if __name__ == "__main__":
    B, S, H, I, R, E, TOP_K = 2, 128, 128, 256, 8, 4, 2
    NORM_TOPK = False          # config.norm_topk_prob (OLMoE default)
    TM = 128                   # token tile (sweep 256 on v6e/v7x at real shapes)

    key = jax.random.PRNGKey(0)
    k_param, k_x = jax.random.split(key)
    params = init_params(k_param, hidden=H, intermediate=I, rank=R,
                         num_experts=E)
    hidden_states = jax.random.normal(k_x, (B, S, H), dtype=jnp.float32)

    # normal forward (experts_to_drop = None)
    out, logits = moe_block_forward(params, hidden_states,
                                    top_k=TOP_K, norm_topk_prob=NORM_TOPK,
                                    tm=TM)
    out = jax.block_until_ready(out)
    logits = jax.block_until_ready(logits)

    ref_out, ref_logits = _reference(params, hidden_states,
                                     top_k=TOP_K, norm_topk_prob=NORM_TOPK)
    assert out.shape == (B, S, H) and logits.shape == (B * S, E)
    assert jnp.allclose(out, ref_out, rtol=2e-2, atol=2e-2), \
        float(jnp.max(jnp.abs(out - ref_out)))
    assert jnp.allclose(logits, ref_logits, rtol=2e-2, atol=2e-2)

    # pruned forward (experts_to_drop masks router logits with -inf)
    out2, logits2 = moe_block_forward(params, hidden_states,
                                      top_k=TOP_K, norm_topk_prob=NORM_TOPK,
                                      experts_to_drop=(1,), tm=TM)
    out2 = jax.block_until_ready(out2)
    ref_out2, ref_logits2 = _reference(params, hidden_states,
                                       top_k=TOP_K, norm_topk_prob=NORM_TOPK,
                                       experts_to_drop=(1,))
    assert jnp.allclose(out2, ref_out2, rtol=2e-2, atol=2e-2)
    assert jnp.allclose(logits2, ref_logits2, rtol=2e-2, atol=2e-2)

    print("KERNEL_OK")
</pallas_src>

<mosaic_0001>
module attributes {stable_mosaic.version = 11 : i64} {
  func.func @_expert_tile_kernel(%arg0: i32, %arg1: memref<8xi32, #tpu.memory_space<smem>>, %arg2: memref<8xi32, #tpu.memory_space<smem>>, %arg3: memref<128x128xbf16, #tpu.memory_space<vmem>>, %arg4: memref<128x512xbf16, #tpu.memory_space<vmem>>, %arg5: memref<128x1xf32, #tpu.memory_space<vmem>>, %arg6: memref<1x128x16xbf16, #tpu.memory_space<vmem>>, %arg7: memref<1x16x512xbf16, #tpu.memory_space<vmem>>, %arg8: memref<1x256x8xbf16, #tpu.memory_space<vmem>>, %arg9: memref<1x8x128xbf16, #tpu.memory_space<vmem>>, %arg10: memref<256x128xbf16, #tpu.memory_space<vmem>>, %arg11: memref<128x128xf32, #tpu.memory_space<vmem>>) attributes {dimension_semantics = [#tpu.dimension_semantics<parallel>], iteration_bounds = array<i64: 8>, scalar_prefetch = 2 : i64, scratch_operands = 0 : i64, tpu.core_type = #tpu.core_type<tc>, window_params = [{transform_indices = @transform_0, window_bounds = array<i64: 128, 128>}, {transform_indices = @transform_1, window_bounds = array<i64: 128, 512>}, {transform_indices = @transform_2, window_bounds = array<i64: 128, 1>}, {transform_indices = @transform_3, window_bounds = array<i64: 1, 128, 16>}, {transform_indices = @transform_4, window_bounds = array<i64: 1, 16, 512>}, {transform_indices = @transform_5, window_bounds = array<i64: 1, 256, 8>}, {transform_indices = @transform_6, window_bounds = array<i64: 1, 8, 128>}, {pipeline_mode = #tpu.pipeline_mode<synchronous>, transform_indices = @transform_7, window_bounds = array<i64: 256, 128>}, {transform_indices = @transform_8, window_bounds = array<i64: 128, 128>}]} {
    %0 = arith.index_cast %arg0 : i32 to index
    %1 = memref.load %arg2[%0] : memref<8xi32, #tpu.memory_space<smem>>
    %c0_i32 = arith.constant 0 : i32
    %2 = arith.cmpi ne, %1, %c0_i32 : i32
    %3 = arith.extui %2 : i1 to i32
    %c0_i32_0 = arith.constant 0 : i32
    %4 = arith.cmpi ne, %3, %c0_i32_0 : i32
    scf.if %4 {
      %c0 = arith.constant 0 : index
      %c0_3 = arith.constant 0 : index
      %10 = vector.load %arg3[%c0, %c0_3] : memref<128x128xbf16, #tpu.memory_space<vmem>>, vector<128x128xbf16>
      %c0_4 = arith.constant 0 : index
      %c0_5 = arith.constant 0 : index
      %c0_6 = arith.constant 0 : index
      %11 = vector.load %arg6[%c0_4, %c0_5, %c0_6] : memref<1x128x16xbf16, #tpu.memory_space<vmem>>, vector<1x128x16xbf16>
      %12 = vector.shape_cast %11 : vector<1x128x16xbf16> to vector<128x16xbf16>
      %cst = arith.constant dense<0.000000e+00> : vector<128x16xf32>
      %13 = tpu.matmul %10, %12, %cst {dimension_numbers = #tpu.dot_dimension_numbers<[1], [0], [0], [1], [0, 0, 1, 1], [], []>} : vector<128x128xbf16>, vector<128x16xbf16>, vector<128x16xf32> -> vector<128x16xf32>
      %14 = arith.truncf %13 : vector<128x16xf32> to vector<128x16xbf16>
      %c0_7 = arith.constant 0 : index
      %c0_8 = arith.constant 0 : index
      %15 = vector.load %arg4[%c0_7, %c0_8] : memref<128x512xbf16, #tpu.memory_space<vmem>>, vector<128x512xbf16>
      %16 = arith.extf %15 : vector<128x512xbf16> to vector<128x512xf32>
      %c0_9 = arith.constant 0 : index
      %c0_10 = arith.constant 0 : index
      %c0_11 = arith.constant 0 : index
      %17 = vector.load %arg7[%c0_9, %c0_10, %c0_11] : memref<1x16x512xbf16, #tpu.memory_space<vmem>>, vector<1x16x512xbf16>
      %18 = vector.shape_cast %17 : vector<1x16x512xbf16> to vector<16x512xbf16>
      %cst_12 = arith.constant dense<0.000000e+00> : vector<128x512xf32>
      %19 = tpu.matmul %14, %18, %cst_12 {dimension_numbers = #tpu.dot_dimension_numbers<[1], [0], [0], [1], [0, 0, 1, 1], [], []>} : vector<128x16xbf16>, vector<16x512xbf16>, vector<128x512xf32> -> vector<128x512xf32>
      %20 = arith.addf %16, %19 : vector<128x512xf32>
      %21 = vector.extract_strided_slice %20 {offsets = [0, 0], sizes = [128, 256], strides = [1, 1]} : vector<128x512xf32> to vector<128x256xf32>
      %22 = vector.extract_strided_slice %20 {offsets = [0, 256], sizes = [128, 256], strides = [1, 1]} : vector<128x512xf32> to vector<128x256xf32>
      %cst_13 = arith.constant 0.000000e+00 : f32
      %23 = vector.broadcast %cst_13 : f32 to vector<128x256xf32>
      %24 = arith.subf %23, %21 : vector<128x256xf32>
      %25 = math.exp %24 : vector<128x256xf32>
      %cst_14 = arith.constant 1.000000e+00 : f32
      %26 = vector.broadcast %cst_14 : f32 to vector<128x256xf32>
      %27 = arith.addf %26, %25 : vector<128x256xf32>
      %28 = tpu.reciprocal %27 {approx = true} : vector<128x256xf32> -> vector<128x256xf32>
      %29 = arith.mulf %21, %28 : vector<128x256xf32>
      %30 = arith.mulf %29, %22 : vector<128x256xf32>
      %c0_15 = arith.constant 0 : index
      %c0_16 = arith.constant 0 : index
      %31 = vector.load %arg5[%c0_15, %c0_16] : memref<128x1xf32, #tpu.memory_space<vmem>>, vector<128x1xf32>
      %32 = vector.broadcast %31 : vector<128x1xf32> to vector<128x256xf32>
      %33 = arith.mulf %30, %32 : vector<128x256xf32>
      %34 = arith.truncf %33 : vector<128x256xf32> to vector<128x256xbf16>
      %c0_17 = arith.constant 0 : index
      %c0_18 = arith.constant 0 : index
      %35 = vector.load %arg10[%c0_17, %c0_18] : memref<256x128xbf16, #tpu.memory_space<vmem>>, vector<256x128xbf16>
      %cst_19 = arith.constant dense<0.000000e+00> : vector<128x128xf32>
      %36 = tpu.matmul %34, %35, %cst_19 {dimension_numbers = #tpu.dot_dimension_numbers<[1], [0], [0], [1], [0, 0, 1, 1], [], []>} : vector<128x256xbf16>, vector<256x128xbf16>, vector<128x128xf32> -> vector<128x128xf32>
      %c0_20 = arith.constant 0 : index
      %c0_21 = arith.constant 0 : index
      %c0_22 = arith.constant 0 : index
      %37 = vector.load %arg8[%c0_20, %c0_21, %c0_22] : memref<1x256x8xbf16, #tpu.memory_space<vmem>>, vector<1x256x8xbf16>
      %38 = vector.shape_cast %37 : vector<1x256x8xbf16> to vector<256x8xbf16>
      %cst_23 = arith.constant dense<0.000000e+00> : vector<128x8xf32>
      %39 = tpu.matmul %34, %38, %cst_23 {dimension_numbers = #tpu.dot_dimension_numbers<[1], [0], [0], [1], [0, 0, 1, 1], [], []>} : vector<128x256xbf16>, vector<256x8xbf16>, vector<128x8xf32> -> vector<128x8xf32>
      %40 = arith.truncf %39 : vector<128x8xf32> to vector<128x8xbf16>
      %c0_24 = arith.constant 0 : index
      %c0_25 = arith.constant 0 : index
      %c0_26 = arith.constant 0 : index
      %41 = vector.load %arg9[%c0_24, %c0_25, %c0_26] : memref<1x8x128xbf16, #tpu.memory_space<vmem>>, vector<1x8x128xbf16>
      %42 = vector.shape_cast %41 : vector<1x8x128xbf16> to vector<8x128xbf16>
      %cst_27 = arith.constant dense<0.000000e+00> : vector<128x128xf32>
      %43 = tpu.matmul %40, %42, %cst_27 {dimension_numbers = #tpu.dot_dimension_numbers<[1], [0], [0], [1], [0, 0, 1, 1], [], []>} : vector<128x8xbf16>, vector<8x128xbf16>, vector<128x128xf32> -> vector<128x128xf32>
      %44 = arith.addf %36, %43 : vector<128x128xf32>
      %c0_28 = arith.constant 0 : index
      %c0_29 = arith.constant 0 : index
      %45 = vector.load %arg11[%c0_28, %c0_29] : memref<128x128xf32, #tpu.memory_space<vmem>>, vector<128x128xf32>
      tpu.vector_store %arg11[%c0_28, %c0_29], %44 {strides = array<i32>} : memref<128x128xf32, #tpu.memory_space<vmem>>, vector<128x128xf32>,
    } else {
    }
    %5 = arith.index_cast %arg0 : i32 to index
    %6 = memref.load %arg2[%5] : memref<8xi32, #tpu.memory_space<smem>>
    %c0_i32_1 = arith.constant 0 : i32
    %7 = arith.cmpi eq, %6, %c0_i32_1 : i32
    %8 = arith.extui %7 : i1 to i32
    %c0_i32_2 = arith.constant 0 : i32
    %9 = arith.cmpi ne, %8, %c0_i32_2 : i32
    scf.if %9 {
      %cst = arith.constant 0.000000e+00 : f32
      %10 = vector.broadcast %cst : f32 to vector<128x128xf32>
      %c0 = arith.constant 0 : index
      %c0_3 = arith.constant 0 : index
      %11 = vector.load %arg11[%c0, %c0_3] : memref<128x128xf32, #tpu.memory_space<vmem>>, vector<128x128xf32>
      tpu.vector_store %arg11[%c0, %c0_3], %10 {strides = array<i32>} : memref<128x128xf32, #tpu.memory_space<vmem>>, vector<128x128xf32>,
    } else {
    }
    return
  }
  func.func @transform_0(%arg0: i32, %arg1: memref<8xi32, #tpu.memory_space<smem>>, %arg2: memref<8xi32, #tpu.memory_space<smem>>) -> (i32, i32) {
    %c0_i32 = arith.constant 0 : i32
    %c0_i32_0 = arith.constant 0 : i32
    return %arg0, %c0_i32 : i32, i32
  }
  func.func @transform_1(%arg0: i32, %arg1: memref<8xi32, #tpu.memory_space<smem>>, %arg2: memref<8xi32, #tpu.memory_space<smem>>) -> (i32, i32) {
    %c0_i32 = arith.constant 0 : i32
    %c0_i32_0 = arith.constant 0 : i32
    return %arg0, %c0_i32 : i32, i32
  }
  func.func @transform_2(%arg0: i32, %arg1: memref<8xi32, #tpu.memory_space<smem>>, %arg2: memref<8xi32, #tpu.memory_space<smem>>) -> (i32, i32) {
    %c0_i32 = arith.constant 0 : i32
    %c0_i32_0 = arith.constant 0 : i32
    return %arg0, %c0_i32 : i32, i32
  }
  func.func @transform_3(%arg0: i32, %arg1: memref<8xi32, #tpu.memory_space<smem>>, %arg2: memref<8xi32, #tpu.memory_space<smem>>) -> (i32, i32, i32) {
    %0 = arith.index_cast %arg0 : i32 to index
    %1 = memref.load %arg1[%0] : memref<8xi32, #tpu.memory_space<smem>>
    %c0_i32 = arith.constant 0 : i32
    %c0_i32_0 = arith.constant 0 : i32
    %c0_i32_1 = arith.constant 0 : i32
    return %1, %c0_i32, %c0_i32_0 : i32, i32, i32
  }
  func.func @transform_4(%arg0: i32, %arg1: memref<8xi32, #tpu.memory_space<smem>>, %arg2: memref<8xi32, #tpu.memory_space<smem>>) -> (i32, i32, i32) {
    %0 = arith.index_cast %arg0 : i32 to index
    %1 = memref.load %arg1[%0] : memref<8xi32, #tpu.memory_space<smem>>
    %c0_i32 = arith.constant 0 : i32
    %c0_i32_0 = arith.constant 0 : i32
    %c0_i32_1 = arith.constant 0 : i32
    return %1, %c0_i32, %c0_i32_0 : i32, i32, i32
  }
  func.func @transform_5(%arg0: i32, %arg1: memref<8xi32, #tpu.memory_space<smem>>, %arg2: memref<8xi32, #tpu.memory_space<smem>>) -> (i32, i32, i32) {
    %0 = arith.index_cast %arg0 : i32 to index
    %1 = memref.load %arg1[%0] : memref<8xi32, #tpu.memory_space<smem>>
    %c0_i32 = arith.constant 0 : i32
    %c0_i32_0 = arith.constant 0 : i32
    %c0_i32_1 = arith.constant 0 : i32
    return %1, %c0_i32, %c0_i32_0 : i32, i32, i32
  }
  func.func @transform_6(%arg0: i32, %arg1: memref<8xi32, #tpu.memory_space<smem>>, %arg2: memref<8xi32, #tpu.memory_space<smem>>) -> (i32, i32, i32) {
    %0 = arith.index_cast %arg0 : i32 to index
    %1 = memref.load %arg1[%0] : memref<8xi32, #tpu.memory_space<smem>>
    %c0_i32 = arith.constant 0 : i32
    %c0_i32_0 = arith.constant 0 : i32
    %c0_i32_1 = arith.constant 0 : i32
    return %1, %c0_i32, %c0_i32_0 : i32, i32, i32
  }
  func.func @transform_7(%arg0: i32, %arg1: memref<8xi32, #tpu.memory_space<smem>>, %arg2: memref<8xi32, #tpu.memory_space<smem>>) -> (i32, i32) {
    %c0_i32 = arith.constant 0 : i32
    %c0_i32_0 = arith.constant 0 : i32
    %c0_i32_1 = arith.constant 0 : i32
    return %c0_i32, %c0_i32_0 : i32, i32
  }
  func.func @transform_8(%arg0: i32, %arg1: memref<8xi32, #tpu.memory_space<smem>>, %arg2: memref<8xi32, #tpu.memory_space<smem>>) -> (i32, i32) {
    %c0_i32 = arith.constant 0 : i32
    %c0_i32_0 = arith.constant 0 : i32
    return %arg0, %c0_i32 : i32, i32
  }
}

</mosaic_0001>

<bundles_post_ra>
// kernel: tpu_custom_call.1
= control target key start
LH: loop header
LB: loop body
LE: loop exit
PB: predicated region body
PF: predicated region fallthrough
CT: control target
= control target key end

     0   :  { %s4043_s0 = inlined_call_operand.vmem [shape: s32[8], index: 0, kind: input, shape index: {}]   ;;  %s4044_s2 = inlined_call_operand.vmem [shape: bf16[1024,128], index: 2, kind: input, shape index: {}]   ;;  %s4045_s3 = inlined_call_operand.hbm [shape: bf16[1024,512], index: 3, kind: input, shape index: {}]   ;;  %s4046_s4 = inlined_call_operand.vmem [shape: f32[1024,1], index: 4, kind: input, shape index: {}]   ;;  %s4047_s5 = inlined_call_operand.vmem [shape: bf16[4,128,16], index: 5, kind: input, shape index: {}]   ;;  %s4048_s6 = inlined_call_operand.vmem [shape: bf16[4,16,512], index: 6, kind: input, shape index: {}]   ;;  %s4049_s7 = inlined_call_operand.vmem [shape: bf16[4,256,8], index: 7, kind: input, shape index: {}]   ;;  %s4050_s8 = inlined_call_operand.vmem [shape: bf16[4,8,128], index: 8, kind: input, shape index: {}]   ;;  %s4051_s9 = inlined_call_operand.vmem [shape: bf16[256,128], index: 9, kind: input, shape index: {}]   ;;  %s4052_s10 = inlined_call_operand.hbm [shape: f32[1024,128], index: 10, kind: output, shape index: {}]   ;;  %s4053_s1 = inlined_call_operand.vmem [shape: s32[8], index: 1, kind: input, shape index: {}]  }
   0x1   :  { %4075 = sst [smem:[#allocation26_spill]] %s4045_s3  ;;  %s15_s15 = sshll.u32 %s4043_s0, 4  ;;  %s16_s15 = int_to_ptr.vmem [resolvable:$true] %s15_s15 }
   0x2   :  { %4076 = sst [smem:[#allocation27_spill]] %s4052_s10  ;;  %s19_s18 = sshll.u32 %s4053_s1, 4  ;;  %s20_s18 = int_to_ptr.vmem [resolvable:$true] %s19_s18 }
   0x3   :  { %s2865_s19 = scalar_lea.vmem %s16_s15, 16  ;;  %p2870_p1 = scmp.lt.s32.totalorder %s16_s15, %s16_s15 }
   0x4   :  { %p2866_p0 = scmp.ne.s32.totalorder %s16_s15, %s2865_s19  ;;  %p2871_p2 = scmp.lt.s32.totalorder %s2865_s19, %s2865_s19 }
   0x6   :  { %p2872_p3 = por %p2871_p2, %p2870_p1 }
   0x8   :  { %p2873_p4 = pnand %p2872_p3, %p2866_p0 }
   0xa   :  { %2876 = shalt.err (!%p2873_p4)  }
   0xb   :  { %s2989_s20 = smov [#allocation3]   ;;  %s2877_s21 = scalar_lea.vmem %s20_s18, 16 }
   0xc   :  { %18 = dma.vmem_to_smem %s16_s15, 16, %s2989_s20, [#allocation2] }
   0xd   :  { %p2878_p5 = scmp.ne.s32.totalorder %s20_s18, %s2877_s21  ;;  %p2882_p6 = scmp.lt.s32.totalorder %s20_s18, %s20_s18 }
   0xe   :  { %p2883_p7 = scmp.lt.s32.totalorder %s2877_s21, %s2877_s21 }
  0x10   :  { %p2884_p8 = por %p2883_p7, %p2882_p6 }
  0x12   :  { %p2885_p9 = pnand %p2884_p8, %p2878_p5 }
  0x14   :  { %2888 = shalt.err (!%p2885_p9)  }
  0x15   :  { %s2990_s0 = smov [#allocation4]  }
  0x16   :  { %22 = dma.vmem_to_smem %s20_s18, 16, %s2990_s0, [#allocation2] }
  0x17   :  { %2963 = dma.done.wait [#allocation2], 32 }
  0x18   :  { %2964 = vsyncadd [#allocation2], 4294967264 }
  0x19   :  { %24 = sfence }
  0x1a   :  { %25 = vsyncpa [#allocation6], 0 }
  0x1b   :  { %27 = vsyncpa [#allocation6 + $0x1], 0 }
  0x1c   :  { %28 = vsyncpa [#allocation7], 0 }
  0x1d   :  { %30 = vsyncpa [#allocation7 + $0x1], 0  ;;  %s3060_s1 = smov 0   ;;  %s3062_s22 = smov 0  }
  0x1e   :  { %s3064_s23 = smov 0   ;;  %s3066_s24 = smov 0  }
  0x1f LB: > { %4077 = sst [smem:[#allocation12_spill]] %s2975_s1  ;;  %s3081_s25 = sadd.s32 4294967295, %s2987_s24   ;;  %s2987_s24 = sphi %s3066_s24, %s4148_s24   ;;  %s2983_s23 = sphi %s3064_s23, %s4151_s23   ;;  %s2979_s22 = sphi %s3062_s22, %s4150_s22   ;;  %s2975_s1 = sphi %s3060_s1, %s4149_s1  }
  0x20   : > { %4078 = sst [smem:[#allocation13_spill]] %s2979_s22  ;;  %s2311_s26 = sadd.s32 4294967294, %s2987_s24  }
  0x21   : > { %4079 = sst [smem:[#allocation14_spill]] %s2983_s23  ;;  %s3085_s27 = sadd.s32 1, %s2987_s24  }
  0x22   : > { %4080 = sst [smem:[#allocation15_spill]] %s2987_s24  ;;  %s69_s28 = sadd.s32 1, %s2983_s23 }
  0x23   : > { %4081 = sst [smem:[#allocation16_spill]] %s3085_s27  ;;  %s66_s29 = ssub.s32 %s2987_s24, %s3085_s27 }
  0x24   : > { %p76_p10 = scmp.ne.s32.totalorder %s2983_s23, %s2979_s22  ;;  %p67_p11 = scmp.eq.s32.totalorder %s66_s29, 0 }
  0x25   : > { %p77_p12 = scmp.eq.s32.totalorder %s2987_s24, 0  ;;  %p82_p13 = scmp.ne.s32.totalorder %s2979_s22, %s2975_s1 }
  0x26   : > { %p83_p0 = scmp.eq.s32.totalorder %s3081_s25, 0  ;;  %p265_p3 = scmp.eq.s32.totalorder %s3081_s25, 7 }
  0x27   : > { %s3097_s30 = scalar_select %p67_p11, %s2983_s23, %s69_s28  }
  0x28   : > { %p3099_p1 = por %p77_p12, %p76_p10  ;;  %p3103_p2 = por %p83_p0, %p82_p13 }
  0x29   : > { %4082 = sst [smem:[#allocation17_spill]] %s3097_s30  ;;  %p271_p4 = scmp.eq.s32.totalorder %s2311_s26, 7 }
  0x2a   : > { %p2639_p5 = scmp.lt.s32.totalorder %s2987_s24, 8  ;;  %p3109_p6 = por %p265_p3, %p76_p10 }
  0x2b   : > { %p3113_p7 = por %p271_p4, %p82_p13  ;;  %s303_s15 = sand.u32 1, %s2983_s23  }
  0x2c   : > { %s4085_s13 = scalar_select %p3109_p6, 1, 0 }
  0x2d   : > { %s4087_s14 = scalar_select %p3113_p7, 1, 0 }
  0x2e   : > { %4086 = sst [smem:[#allocation18_spill]] %s4085_s13  ;;  %s2416_s16 = sshll.u32 %s2987_s24, 12 }
  0x2f   : > { %4088 = sst [smem:[#allocation19_spill]] %s4087_s14  ;;  %s2314_s17 = sshll.u32 %s303_s15, 8 }
  0x30   : > { %s4089_s3 = sld [smem:[#allocation26_spill]]  ;;  %s307_s21 = scalar_lea.vmem [#allocation5], %s2314_s17 }
  0x31   : > { %s315_s0 = sshll.u32 %s307_s21, 4  ;;  %p3126_p8 = pnand %p2639_p5, %p3099_p1  ;;  %s3130_s0 = int_to_ptr.vmem [resolvable:$true] %s315_s0 }
  0x32   : > { %s3132_s28 = scalar_lea.sflag [#allocation6], %s303_s15 }
  0x33   : > { %p2891_p10 = pneg %p3126_p8 }
  0x36   : > { %s3122_s20 = scalar_lea.hbm %s4089_s3, %s2416_s16  ;;  %s2894_s17 = scalar_lea.hbm %s4089_s3, 32768 }
  0x37   : > { %s2889_s29 = scalar_lea.hbm %s3122_s20, 4096  ;;  %p2895_p13 = scmp.lt.u32.totalorder %s3122_s20, %s4089_s3 }
  0x38   : > { %p2890_p9 = scmp.ne.s32.totalorder %s3122_s20, %s2889_s29  ;;  %p2896_p0 = scmp.lt.u32.totalorder %s2894_s17, %s2889_s29 }
  0x39   : > { %p2898_p3 = scmp.lt.u32.totalorder %s2889_s29, %s3122_s20 }
  0x3a   : > { %p2892_p11 = pnand %p2891_p10, %p2890_p9  ;;  %p2897_p1 = por %p2896_p0, %p2895_p13 }
  0x3c   : > { %p2893_p12 = pneg %p2892_p11  ;;  %p2899_p4 = por %p2898_p3, %p2897_p1 }
  0x3e   : > { %p2900_p5 = pnand %p2899_p4, %p2893_p12 }
  0x40   : > { %2903 = shalt.err (!%p2900_p5)
}
  0x41   : > { %s2904_s15 = scalar_lea.vmem %s3130_s0, 4096  ;;  %s2991_s21 = smov [#allocation5]  }
  0x42   : > { %p2905_p9 = scmp.ne.s32.totalorder %s3130_s0, %s2904_s15  ;;  %s2909_s16 = sshll.u32 %s2991_s21, 4  ;;  %s2910_s16 = int_to_ptr.vmem [resolvable:$false] %s2909_s16 }
  0x43   : > { %s2911_s11 = scalar_lea.vmem %s2910_s16, 8192  ;;  %p2912_p6 = scmp.lt.s32.totalorder %s3130_s0, %s2910_s16 }
  0x44   : > { %p2907_p11 = pnand %p2905_p9, %p2891_p10  ;;  %p2913_p13 = scmp.lt.s32.totalorder %s2911_s11, %s2904_s15 }
  0x46   : > { %p2908_p7 = pneg %p2907_p11  ;;  %p2914_p0 = por %p2913_p13, %p2912_p6 }
  0x48   : > { %p2915_p1 = pnand %p2914_p0, %p2908_p7 }
  0x4a   : > { %2918 = shalt.err (!%p2915_p1)
}
  0x4b   : > { %s2992_s29 = smov 256   ;;  %s2993_s17 = smov 16  }
  0x4c   : > { %2634 = dma.hbm_to_vmem [thread:$0]  (!%p3126_p8), %s3122_s20, 4096, %s3130_s0, %s3132_s28, %s2992_s29, %s2992_s29, %s2993_s17  }
  0x4d   : > { %p2318_p10 = scmp.ge.s32.totalorder %s2987_s24, 1  ;;  %p371_p12 = scmp.lt.s32.totalorder %s2987_s24, 9 }
  0x4f   : > { %p372_p3 = pnand %p2318_p10, %p371_p12 }
  0x50   : > { %s3163_s18 = sand.u32 (!%p372_p3), 1, %s2979_s22  }
  0x51   : > { %375 = sbr.rel (%p372_p3) target bundleno = 1182 (0x49e), region = 52  ;;  %s2319_s19 = sshll.u32 (!%p372_p3), %s3163_s18, 8 }
  0x52   : > { %s378_s15 = scalar_lea.sflag (!%p372_p3), [#allocation6], %s3163_s18  ;;  %s3167_s21 = scalar_lea.vmem (!%p372_p3), [#allocation5], %s2319_s19 }
  0x58   : > { %2966 = dma.done.wait (%p3103_p2), %s378_s15, 4096  }
  0x59   : > { %2968 = vsyncadd (%p3103_p2), %s378_s15, 4294963200  ;;  %s2321_s0 = sshll.u32 %s3081_s25, 4  ;;  %s460_s26 = sld [smem:[#allocation3 + %s3081_s25]] }
  0x5a   : > { %s467_s28 = sld [smem:[#allocation3 + %s3081_s25]]  ;;  %p448_p6 = scmp.lt.s32.totalorder %s2321_s0, 127 }
  0x5b   : > { %s474_s16 = sld [smem:[#allocation3 + %s3081_s25]]  ;;  %s4091_s14 = sshll.u32 %s3163_s18, 7 }
  0x5c   : > { %s481_s11 = sld [smem:[#allocation3 + %s3081_s25]]  ;;  %s4153_s0 = smov (!%p448_p6, %s2321_s0), 127 }
  0x5d   : > { %s489_s29 = sld [smem:[#allocation4 + %s3081_s25]]  ;;  %s2322_s17 = sshll.u32 %s4153_s0, 2 }
  0x5e   : > { %s3193_s1 = scalar_lea.vmem %s4044_s2, %s2322_s17  ;;  %s2324_s24 = sshll.u32 %s4153_s0, 3 }
  0x5f   : > { %p461_p7 = scmp.lt.s32.totalorder %s460_s26, 3  ;;  %s3208_s27 = scalar_lea.vmem %s4046_s4, %s2324_s24 }
  0x60   : > { %p468_p8 = scmp.lt.s32.totalorder %s467_s28, 3  ;;  %s3212_s17 = scalar_lea.vmem [#allocation8], %s4091_s14 }
  0x61   : > { %p475_p4 = scmp.lt.s32.totalorder %s474_s16, 3  ;;  %s4155_s26 = smov (!%p461_p7, %s460_s26), 3 }
  0x62   : > { %p482_p2 = scmp.lt.s32.totalorder %s481_s11, 3  ;;  %s4157_s28 = smov (!%p468_p8, %s467_s28), 3 }
  0x63   : > { %s2417_s12 = sshll.u32 %s4155_s26, 6  ;;  %s2418_s3 = sshll.u32 %s4157_s28, 5 }
  0x64   : > { %s3183_s20 = scalar_lea.vmem %s4047_s5, %s2417_s12  ;;  %s3188_s22 = scalar_lea.vmem %s4048_s6, %s2418_s3 }
  0x65   : > { %s4159_s16 = smov (!%p475_p4, %s474_s16), 3  ;;  %s4161_s11 = smov (!%p482_p2, %s481_s11), 3 }
  0x66   : > { %s2419_s26 = sshll.u32 %s4159_s16, 7  ;;  %s2331_s28 = sshll.u32 %s4161_s11, 2 }
  0x67   : > { %s3198_s12 = scalar_lea.vmem %s4049_s7, %s2419_s26  ;;  %s3203_s3 = scalar_lea.vmem %s4050_s8, %s2331_s28 }
  0x68   : > { %p2332_p5 = scmp.eq.s32.totalorder %s489_s29, 0 }
  0x6a   : > { %493 = sbr.rel (%p2332_p5) target bundleno = 1138 (0x472), region = 60 }
  0x71   : > { %v2683_v0 = vld [vmem:[%s3183_s20] sm:$0xff]   ;;  %v2684_v1 = vld [vmem:[%s3183_s20 + $0x8] sm:$0xff]   ;;  %v2685_v2 = vld [vmem:[%s3183_s20 + $0x10] sm:$0xff]   ;;  %v2994_v18 = vmov 0   ;;  %vm847_vm0 = vcmask 130048   ;;  %vm1821_vm1 = vcmask 1043456  }
  0x72   : > { %2574 = vmatprep.subr.bf16.mxu0 %v2683_v0  ;;  %v2686_v3 = vld [vmem:[%s3183_s20 + $0x18] sm:$0xff]   ;;  %v2691_v4 = vld [vmem:[%s3193_s1] sm:$0xff]   ;;  %v2688_v6 = vld [vmem:[%s3183_s20 + $0x28] sm:$0xff]   ;;  %924 = vmatprep.mubr.bf16.mxu1 %v2994_v18  ;;  %vm1796_vm2 = vcmask 64512  }
  0x73   : > { %2575 = vmatpush3.bf16.msra.mxu0 %v2683_v0  ;;  %2590 = vmatprep.mubr.bf16.mxu0 %v2691_v4  ;;  %v2687_v5 = vld [vmem:[%s3183_s20 + $0x20] sm:$0xff]   ;;  %v2689_v9 = vld [vmem:[%s3183_s20 + $0x30] sm:$0xff]   ;;  %v2690_v10 = vld [vmem:[%s3183_s20 + $0x38] sm:$0xff]  }
  0x74   : > { %2576 = vmatprep.subr.bf16.mxu0 %v2684_v1  ;;  %v2699_v7 = vld [vmem:[%s3188_s22] ss:$16 sps:$4 sm:$0xff]   ;;  %v2701_v8 = vld [vmem:[%s3188_s22 + $0x4] ss:$16 sps:$4 sm:$0xff]   ;;  %v2692_v11 = vld [vmem:[%s3193_s1 + $0x8] sm:$0xff]   ;;  %2681 = vset.pattern.permute.xlu0 %v2994_v18 }
  0x75   : > { %2624 = vmatprep.subr.bf16.mxu1 %v2701_v8  ;;  %v2693_v12 = vld [vmem:[%s3193_s1 + $0x10] sm:$0xff]   ;;  %v2694_v13 = vld [vmem:[%s3193_s1 + $0x18] sm:$0xff]   ;;  %v2695_v14 = vld [vmem:[%s3193_s1 + $0x20] sm:$0xff]   ;;  %2682 = vset.pattern.permute.xlu1 %v2994_v18 }
  0x76   : > { %2625 = vmatpush1.bf16.msra.mxu1 %v2699_v7  ;;  %v2696_v15 = vld [vmem:[%s3193_s1 + $0x28] sm:$0xff]   ;;  %v2697_v16 = vld [vmem:[%s3193_s1 + $0x30] sm:$0xff]   ;;  %v2698_v17 = vld [vmem:[%s3193_s1 + $0x38] sm:$0xff]  }
  0x77   : > { %2577 = vmatpush3.bf16.msra.mxu0 %v2684_v1  ;;  %v2704_v19 = vld [vmem:[%s3188_s22 + $0xc] ss:$16 sps:$4 sm:$0xff]   ;;  %v1386_v20 = vld [vmem:[%s3208_s27] sm:$0xff]  ;;  %v1388_v21 = vld [vmem:[%s3208_s27 + $0x10] sm:$0xff] }
  0x78   : > { %2578 = vmatprep.subr.bf16.mxu0 %v2685_v2  ;;  %1404 = vperm.xlu0 %2681, %v1386_v20   ;;  %v1387_v22 = vld [vmem:[%s3208_s27 + $0x8] sm:$0xff]  ;;  %v1389_v23 = vld [vmem:[%s3208_s27 + $0x18] sm:$0xff]  ;;  %v2705_v24 = vld [vmem:[%s3198_s12 + $0x40] sm:$0xff]  }
  0x79   : > { %1414 = vperm.xlu1 %2682, %v1388_v21   ;;  %v1390_v25 = vld [vmem:[%s3208_s27 + $0x20] sm:$0xff]  ;;  %v1391_v26 = vld [vmem:[%s3208_s27 + $0x28] sm:$0xff]  ;;  %2437 = vmatprep.subr.bf16.mxu1 %v2705_v24  ;;  %v1392_v27 = vld [vmem:[%s3208_s27 + $0x30] sm:$0xff] }
  0x7a   : > { %v1393_v28 = vld [vmem:[%s3208_s27 + $0x38] sm:$0xff]  ;;  %v1394_v29 = vld [vmem:[%s3208_s27 + $0x40] sm:$0xff]  ;;  %v1395_v30 = vld [vmem:[%s3208_s27 + $0x48] sm:$0xff] }
  0x7b   : > { %2579 = vmatpush3.bf16.msra.mxu0 %v2685_v2  ;;  %v1396_v31 = vld [vmem:[%s3208_s27 + $0x50] sm:$0xff]  ;;  %v1397_v32 = vld [vmem:[%s3208_s27 + $0x58] sm:$0xff]  ;;  %v1398_v33 = vld [vmem:[%s3208_s27 + $0x60] sm:$0xff] }
  0x7c   : > { %2580 = vmatprep.subr.bf16.mxu0 %v2686_v3  ;;  %1409 = vperm.xlu0 %2681, %v1387_v22   ;;  %v1399_v34 = vld [vmem:[%s3208_s27 + $0x68] sm:$0xff]  ;;  %v1400_v35 = vld [vmem:[%s3208_s27 + $0x70] sm:$0xff]  ;;  %v1401_v36 = vld [vmem:[%s3208_s27 + $0x78] sm:$0xff] }
  0x7d   : > { %1419 = vperm.xlu1 %2682, %v1389_v23   ;;  %v2702_v42 = vld [vmem:[%s3188_s22 + $0x8] ss:$16 sps:$4 sm:$0xff]   ;;  %v2706_v50 = vld [vmem:[%s3198_s12] sm:$0xff]   ;;  %v2709_v1 = vld [vmem:[%s3198_s12 + $0x50] sm:$0xff]  }
  0x7e   : > { %v2707_v63 = vld [vmem:[%s3198_s12 + $0x48] sm:$0xff]   ;;  %v2710_v2 = vld [vmem:[%s3198_s12 + $0x10] sm:$0xff]   ;;  %v2712_v4 = vld [vmem:[%s3198_s12 + $0x18] sm:$0xff]  }
  0x7f   : > { %2581 = vmatpush3.bf16.msra.mxu0 %v2686_v3  ;;  %v2708_v0 = vld [vmem:[%s3198_s12 + $0x8] sm:$0xff]   ;;  %v2711_v3 = vld [vmem:[%s3198_s12 + $0x58] sm:$0xff]   ;;  %v3318_v23 = vld [vmem:[%s3167_s21 + $0x60] sm:$0xff] }
  0x80   : > { %2582 = vmatprep.subr.bf16.mxu0 %v2687_v5  ;;  %1424 = vperm.xlu0 %2681, %v1390_v25   ;;  %v3321_v24 = vld [vmem:[%s3167_s21 + $0x8] sm:$0xff] }
  0x81   : > { %1429 = vperm.xlu1 %2682, %v1391_v26  }
  0x83   : > { %2583 = vmatpush3.bf16.msra.mxu0 %v2687_v5  ;;  %v2713_v5 = vld [vmem:[%s3198_s12 + $0x60] sm:$0xff]  }
  0x84   : > { %2584 = vmatprep.subr.bf16.mxu0 %v2688_v6  ;;  %1434 = vperm.xlu0 %2681, %v1392_v27  }
  0x85   : > { %1439 = vperm.xlu1 %2682, %v1393_v28  }
  0x87   : > { %2585 = vmatpush3.bf16.msra.mxu0 %v2688_v6  ;;  %v2714_v6 = vld [vmem:[%s3198_s12 + $0x20] sm:$0xff]  }
  0x88   : > { %2586 = vmatprep.subr.bf16.mxu0 %v2689_v9  ;;  %1444 = vperm.xlu0 %2681, %v1394_v29   ;;  %v3327_v29 = vld [vmem:[%s3167_s21 + $0x70] sm:$0xff] }
  0x89   : > { %1449 = vperm.xlu1 %2682, %v1395_v30   ;;  %v3330_v30 = vld [vmem:[%s3167_s21 + $0x18] sm:$0xff] }
  0x8b   : > { %2587 = vmatpush3.bf16.msra.mxu0 %v2689_v9  ;;  %v2717_v9 = vld [vmem:[%s3198_s12 + $0x70] sm:$0xff]  }
  0x8c   : > { %2588 = vmatprep.subr.bf16.mxu0 %v2690_v10  ;;  %1454 = vperm.xlu0 %2681, %v1396_v31  }
  0x8d   : > { %1459 = vperm.xlu1 %2682, %v1397_v32  }
  0x8f   : > { %2589 = vmatpush3.bf16.msra.mxu0 %v2690_v10  ;;  %v2718_v10 = vld [vmem:[%s3198_s12 + $0x30] sm:$0xff]  }
  0x90   : > { %872 = vmatprep.subr.bf16.mxu0 %v2701_v8  ;;  %1464 = vperm.xlu0 %2681, %v1398_v33   ;;  %v2716_v8 = vld [vmem:[%s3198_s12 + $0x28] sm:$0xff]  }
  0x91   : > { %1469 = vperm.xlu1 %2682, %v1399_v34  }
  0x92   : > { %2591 = vmatmul.mubr.bf16.vlgmr.msra.gmra.mrb[0].mxu0 %v2692_v11  ;;  %v2719_v11 = vld [vmem:[%s3198_s12 + $0x78] sm:$0xff]  }
  0x93   : > { %2594 = vmatprep.mubr.bf16.mxu0 %v2693_v12  ;;  %873 = vmatpush1.bf16.msra.mxu0 %v2699_v7  ;;  %v2715_v7 = vld [vmem:[%s3198_s12 + $0x68] sm:$0xff]   ;;  %v2720_v12 = vld [vmem:[%s3198_s12 + $0x38] sm:$0xff]  }
  0x94   : > { %985 = vmatprep.subr.bf16.mxu0 %v2704_v19  ;;  %1474 = vperm.xlu0 %2681, %v1400_v35   ;;  %v3315_v19 = vld [vmem:[%s3167_s21 + $0x50] sm:$0xff]  ;;  %v3337_v35 = vld [vmem:[%s3167_s21 + $0x80] sm:$0xff] }
  0x95   : > { %1479 = vperm.xlu1 %2682, %v1401_v36   ;;  %v779_v33 = vunpack.c.l.bf16 %v3315_v19  ;;  %v3340_v36 = vld [vmem:[%s3167_s21 + $0x28] sm:$0xff] }
  0x9a   : > { %2595 = vmatmul.mubr.bf16.gmra.mrb[4].mxu0 %v2694_v13  ;;  %v2721_v13 = vld [vmem:[%s4051_s9 + $0x40] sm:$0xff]  }
  0x9b   : > { %2598 = vmatprep.mubr.bf16.mxu0 %v2695_v14  ;;  %v727_v14 = vld [vmem:[%s3167_s21] sm:$0xff] }
  0x9c   : > { %v759_v20 = vunpack.c.l.bf16 %v727_v14  ;;  %v760_v21 = vunpack.c.h.bf16 %v727_v14 }
  0xa2   : > { %2599 = vmatmul.mubr.bf16.gmra.mrb[8].mxu0 %v2696_v15  ;;  %v729_v15 = vld [vmem:[%s3167_s21 + $0x10] sm:$0xff] }
  0xa3   : > { %2602 = vmatprep.mubr.bf16.mxu0 %v2697_v16  ;;  %v3306_v16 = vld [vmem:[%s3167_s21 + $0x20] sm:$0xff]  ;;  %v763_v22 = vunpack.c.l.bf16 %v729_v15  ;;  %v764_v25 = vunpack.c.h.bf16 %v729_v15 }
  0xa4   : > { %v767_v26 = vunpack.c.l.bf16 %v3306_v16  ;;  %v768_v28 = vunpack.c.h.bf16 %v3306_v16 }
  0xaa   : > { %2603 = vmatmul.mubr.bf16.gmra.mrb[12].mxu0 %v2698_v17  ;;  %v3309_v17 = vld [vmem:[%s3167_s21 + $0x40] sm:$0xff] }
  0xab   : > { %904 = vmatprep.mubr.bf16.mxu0 %v2994_v18  ;;  %v775_v27 = vunpack.c.l.bf16 %v3309_v17  ;;  %v776_v31 = vunpack.c.h.bf16 %v3309_v17 }
 0x165   : > { %v2592_v37 = vpop.f32.mrb[0].mxu0 }
 0x166   : > { %v656_v38 = vpop.f32.mrb[1].mxu0 }
 0x167   : > { %v2593_v39 = vpop.f32.mrb[2].mxu0 }
 0x168   : > { %v720_v40 = vpack.c.bf16 %v2593_v39, %v2592_v37  ;;  %v659_v41 = vpop.f32.mrb[3].mxu0  ;;  %v780_v37 = vunpack.c.h.bf16 %v3315_v19  ;;  %v761_v39 = vunpack.c.l.bf16 %v3321_v24 }
 0x169   : > { %v719_v43 = vpack.c.bf16 %v659_v41, %v656_v38  ;;  %v783_v38 = vunpack.c.l.bf16 %v3318_v23  ;;  %v3347_v41 = vld [vmem:[%s3167_s21 + $0x90] sm:$0xff] }
 0x16b   : > { %2353 = vmatmul.mubr.msk.bf16.vlgmr.msra.gmra.mrb[16].mxu0 %vm847_vm0, %v719_v43 }
 0x16c   : > { %914 = vmatprep.mubr.bf16.mxu0 %v2994_v18  ;;  %986 = vmatpush1.bf16.msra.mxu0 %v2702_v42  ;;  %v3350_v42 = vld [vmem:[%s3167_s21 + $0x38] sm:$0xff] }
 0x16d   : > { %v2596_v44 = vpop.f32.mrb[4].mxu0 }
 0x16e   : > { %v672_v45 = vpop.f32.mrb[5].mxu0 }
 0x16f   : > { %v2597_v46 = vpop.f32.mrb[6].mxu0 }
 0x170   : > { %v722_v47 = vpack.c.bf16 %v2597_v46, %v2596_v44  ;;  %v675_v48 = vpop.f32.mrb[7].mxu0  ;;  %v787_v44 = vunpack.c.l.bf16 %v3327_v29  ;;  %v788_v46 = vunpack.c.h.bf16 %v3327_v29 }
 0x171   : > { %v721_v49 = vpack.c.bf16 %v675_v48, %v672_v45  ;;  %v765_v45 = vunpack.c.l.bf16 %v3330_v30 }
 0x173   : > { %2354 = vmatmul.mubr.msk.bf16.gmra.mrb[20].mxu0 %vm847_vm0, %v720_v40  ;;  %2355 = vmatmul.mubr.msk.bf16.vlgmr.msra.gmra.mrb[0].mxu1 %vm847_vm0, %v721_v49 }
 0x174   : > { %934 = vmatprep.mubr.bf16.mxu1 %v2994_v18  ;;  %1017 = vmatprep.mubr.bf16.mxu0 %v2994_v18 }
 0x175   : > { %v2600_v51 = vpop.f32.mrb[8].mxu0  ;;  %2438 = vmatpush3.bf16.msra.mxu1 %v2706_v50  ;;  %v791_v50 = vunpack.c.l.bf16 %v3337_v35 }
 0x176   : > { %v688_v52 = vpop.f32.mrb[9].mxu0  ;;  %2439 = vmatprep.subr.bf16.mxu1 %v2707_v63 }
 0x177   : > { %v2601_v53 = vpop.f32.mrb[10].mxu0 }
 0x178   : > { %v724_v54 = vpack.c.bf16 %v2601_v53, %v2600_v51  ;;  %v691_v55 = vpop.f32.mrb[11].mxu0  ;;  %v3364_v53 = vld [vmem:[%s3167_s21 + $0x48] sm:$0xff] }
 0x179   : > { %v723_v56 = vpack.c.bf16 %v691_v55, %v688_v52  ;;  %2440 = vmatpush3.bf16.msra.mxu1 %v2708_v0  ;;  %v3491_v52 = vld [vmem:[%s3167_s21 + $0xb8] sm:$0xff] }
 0x17a   : > { %2441 = vmatprep.subr.bf16.mxu1 %v2709_v1  ;;  %v3380_v1 = vld [vmem:[%s3167_s21 + $0x58] sm:$0xff]  ;;  %4095 = vst [vmem:[#allocation23_spill] sm:$0xff] %v3491_v52 }
 0x17b   : > { %2356 = vmatmul.mubr.msk.bf16.gmra.mrb[4].mxu1 %vm847_vm0, %v722_v47  ;;  %2361 = vmatmul.mubr.msk.bf16.vlgmr.msra.gmra.mrb[24].mxu0 %vm847_vm0, %v719_v43  ;;  %v762_v43 = vunpack.c.h.bf16 %v3321_v24 }
 0x17c   : > { %944 = vmatprep.mubr.bf16.mxu1 %v2994_v18  ;;  %1027 = vmatprep.mubr.bf16.mxu0 %v2994_v18 }
 0x17d   : > { %v2604_v57 = vpop.f32.mrb[12].mxu0  ;;  %2442 = vmatpush3.bf16.msra.mxu1 %v2710_v2 }
 0x17e   : > { %v704_v58 = vpop.f32.mrb[13].mxu0  ;;  %2443 = vmatprep.subr.bf16.mxu1 %v2711_v3 }
 0x17f   : > { %v2605_v59 = vpop.f32.mrb[14].mxu0 }
 0x180   : > { %v726_v60 = vpack.c.bf16 %v2605_v59, %v2604_v57  ;;  %v707_v61 = vpop.f32.mrb[15].mxu0  ;;  %v3372_v59 = vld [vmem:[%s3167_s21 + $0xb0] sm:$0xff] }
 0x181   : > { %v725_v62 = vpack.c.bf16 %v707_v61, %v704_v58  ;;  %2444 = vmatpush3.bf16.msra.mxu1 %v2712_v4  ;;  %v3461_v58 = vld [vmem:[%s3167_s21 + $0x98] sm:$0xff] }
 0x182   : > { %2445 = vmatprep.subr.bf16.mxu1 %v2713_v5  ;;  %4093 = vst [vmem:[#allocation21_spill] sm:$0xff] %v3461_v58 }
 0x183   : > { %2357 = vmatmul.mubr.msk.bf16.gmra.mrb[8].mxu1 %vm847_vm0, %v723_v56  ;;  %2362 = vmatmul.mubr.msk.bf16.gmra.mrb[28].mxu0 %vm847_vm0, %v720_v40  ;;  %v784_v40 = vunpack.c.h.bf16 %v3318_v23  ;;  %v4098_v23 = vunpack.c.l.bf16 %v3347_v41 }
 0x184   : > { %954 = vmatprep.mubr.bf16.mxu1 %v2994_v18  ;;  %1037 = vmatprep.mubr.bf16.mxu0 %v2994_v18 }
 0x185   : > { %2446 = vmatpush3.bf16.msra.mxu1 %v2714_v6 }
 0x186   : > { %2447 = vmatprep.subr.bf16.mxu1 %v2715_v7  ;;  %v3388_v7 = vld [vmem:[%s3167_s21 + $0xc0] sm:$0xff] }
 0x189   : > { %2448 = vmatpush3.bf16.msra.mxu1 %v2716_v8 }
 0x18a   : > { %2449 = vmatprep.subr.bf16.mxu1 %v2717_v9 }
 0x18b   : > { %2358 = vmatmul.mubr.msk.bf16.gmra.mrb[12].mxu1 %vm847_vm0, %v724_v54  ;;  %2363 = vmatmul.mubr.msk.bf16.gmra.mrb[32].mxu0 %vm847_vm0, %v721_v49 }
 0x18c   : > { %964 = vmatprep.mubr.bf16.mxu1 %v2994_v18  ;;  %1047 = vmatprep.mubr.bf16.mxu0 %v2994_v18 }
 0x18d   : > { %2450 = vmatpush3.bf16.msra.mxu1 %v2718_v10 }
 0x18e   : > { %2451 = vmatprep.subr.bf16.mxu1 %v2719_v11 }
 0x191   : > { %2452 = vmatpush3.bf16.msra.mxu1 %v2720_v12  ;;  %v3396_v12 = vld [vmem:[%s3167_s21 + $0x68] sm:$0xff] }
 0x192   : > { %2510 = vmatprep.subr.bf16.mxu1 %v2721_v13 }
 0x193   : > { %2359 = vmatmul.mubr.msk.bf16.gmra.mrb[16].mxu1 %vm847_vm0, %v725_v62  ;;  %2364 = vmatmul.mubr.msk.bf16.gmra.mrb[36].mxu0 %vm847_vm0, %v722_v47  ;;  %v3357_v47 = vld [vmem:[%s3167_s21 + $0xa0] sm:$0xff] }
 0x194   : > { %974 = vmatprep.mubr.bf16.mxu1 %v2994_v18  ;;  %1057 = vmatprep.mubr.bf16.mxu0 %v2994_v18 }
 0x19b   : > { %2360 = vmatmul.mubr.msk.bf16.gmra.mrb[20].mxu1 %vm847_vm0, %v726_v60  ;;  %2365 = vmatmul.mubr.msk.bf16.gmra.mrb[40].mxu0 %vm847_vm0, %v723_v56 }
 0x19c   : > { %1067 = vmatprep.mubr.bf16.mxu0 %v2994_v18 }
 0x1a3   : > { %2366 = vmatmul.mubr.msk.bf16.gmra.mrb[44].mxu0 %vm847_vm0, %v724_v54 }
 0x1a4   : > { %1077 = vmatprep.mubr.bf16.mxu0 %v2994_v18 }
 0x1ab   : > { %2367 = vmatmul.mubr.msk.bf16.gmra.mrb[48].mxu0 %vm847_vm0, %v725_v62 }
 0x1ac   : > { %1087 = vmatprep.mubr.bf16.mxu0 %v2994_v18  ;;  %v3312_v18 = vld [vmem:[%s3167_s21 + $0x30] sm:$0xff] }
 0x1ad   : > { %v771_v32 = vunpack.c.l.bf16 %v3312_v18  ;;  %v772_v34 = vunpack.c.h.bf16 %v3312_v18 }
 0x1b3   : > { %2368 = vmatmul.mubr.msk.bf16.gmra.mrb[52].mxu0 %vm847_vm0, %v726_v60 }
 0x23e   : > { %v906_v48 = vpop.f32.mrb[16].mxu0 }
 0x23f   : > { %v3366_v54 = vadd.f32 %v906_v48, %v759_v20  ;;  %v908_v55 = vpop.f32.mrb[17].mxu0 }
 0x240   : > { %v3374_v60 = vadd.f32 %v908_v55, %v760_v21  ;;  %v910_v61 = vpop.f32.mrb[18].mxu0  ;;  %v3402_v21 = vld [vmem:[%s3167_s21 + $0xd0] sm:$0xff] }
 0x241   : > { %v1162_v2 = vsub.f32 0.0, %v3366_v54  ;;  %v3383_v3 = vadd.f32 %v910_v61, %v763_v22  ;;  %v912_v4 = vpop.f32.mrb[19].mxu0  ;;  %v3408_v61 = vld [vmem:[%s3167_s21 + $0x78] sm:$0xff] }
 0x242   : > { %v1163_v8 = vsub.f32 0.0, %v3374_v60  ;;  %v3391_v9 = vadd.f32 %v912_v4, %v764_v25  ;;  %v3453_v4 = vld [vmem:[%s3167_s21 + $0xf0] sm:$0xff] }
 0x243   : > { %v1194_v13 = vmul.f32 1.442695, %v1162_v2  ;;  %v1164_v14 = vsub.f32 0.0, %v3383_v3  ;;  %4092 = vst [vmem:[#allocation20_spill] sm:$0xff] %v3453_v4 }
 0x244   : > { %v1196_v22 = vmul.f32 1.442695, %v1163_v8  ;;  %v1165_v48 = vsub.f32 0.0, %v3391_v9 }
 0x245   : > { %2737 = vpow2.f32 %v1194_v13  ;;  %v1198_v2 = vmul.f32 1.442695, %v1164_v14 }
 0x246   : > { %2739 = vpow2.f32 %v1196_v22  ;;  %v1200_v20 = vmul.f32 1.442695, %v1165_v48  ;;  %v916_v11 = vpop.f32.mrb[20].mxu0  ;;  %v926_v63 = vpop.f32.mrb[0].mxu1  ;;  %v3424_v48 = vld [vmem:[%s3167_s21 + $0xe0] sm:$0xff] }
 0x247   : > { %2741 = vpow2.f32 %v1198_v2  ;;  %v3416_v55 = vadd.f32 %v916_v11, %v767_v26  ;;  %v3420_v13 = vadd.f32 %v926_v63, %v775_v27  ;;  %v918_v14 = vpop.f32.mrb[21].mxu0  ;;  %v928_v15 = vpop.f32.mrb[1].mxu1 }
 0x248   : > { %2743 = vpow2.f32 %v1200_v20  ;;  %v3428_v10 = vadd.f32 %v918_v14, %v768_v28  ;;  %v3432_v26 = vadd.f32 %v928_v15, %v776_v31  ;;  %v920_v11 = vpop.f32.mrb[22].mxu0  ;;  %v930_v27 = vpop.f32.mrb[2].mxu1  ;;  %v3443_v14 = vld [vmem:[%s3167_s21 + $0x88] sm:$0xff] }
 0x249   : > { %v1166_v2 = vsub.f32 0.0, %v3416_v55  ;;  %v1170_v22 = vsub.f32 0.0, %v3420_v13  ;;  %v3439_v20 = vadd.f32 %v920_v11, %v771_v32  ;;  %v922_v16 = vpop.f32.mrb[23].mxu0  ;;  %v932_v28 = vpop.f32.mrb[3].mxu1  ;;  %v3449_v63 = vadd.f32 %v930_v27, %v779_v33 }
 0x24a   : > { %v1167_v31 = vsub.f32 0.0, %v3428_v10  ;;  %v1171_v15 = vsub.f32 0.0, %v3432_v26  ;;  %v3458_v17 = vadd.f32 %v922_v16, %v772_v34  ;;  %v3465_v33 = vadd.f32 %v932_v28, %v780_v37 }
 0x24b   : > { %v1202_v32 = vmul.f32 1.442695, %v1166_v2  ;;  %v1210_v11 = vmul.f32 1.442695, %v1170_v22  ;;  %v1168_v25 = vsub.f32 0.0, %v3439_v20  ;;  %v1172_v18 = vsub.f32 0.0, %v3449_v63 }
 0x24c   : > { %v1204_v6 = vmul.f32 1.442695, %v1167_v31  ;;  %v1212_v5 = vmul.f32 1.442695, %v1171_v15  ;;  %v1169_v28 = vsub.f32 0.0, %v3458_v17  ;;  %v3480_v2 = vld [vmem:[%s3167_s21 + $0xa8] sm:$0xff] }
 0x24d   : > { %2745 = vpow2.f32 %v1202_v32  ;;  %v1206_v8 = vmul.f32 1.442695, %v1168_v25  ;;  %4094 = vst [vmem:[#allocation22_spill] sm:$0xff] %v3480_v2  ;;  %v1173_v31 = vsub.f32 0.0, %v3465_v33  ;;  %v1214_v57 = vmul.f32 1.442695, %v1172_v18 }
 0x24e   : > { %2747 = vpow2.f32 %v1210_v11  ;;  %v936_v34 = vpop.f32.mrb[4].mxu1  ;;  %v1019_v16 = vpop.f32.mrb[24].mxu0 }
 0x24f   : > { %v2738_v37 = vpop.eup %2737  ;;  %2749 = vpow2.f32 %v1204_v6  ;;  %v3476_v25 = vadd.f32 %v936_v34, %v783_v38  ;;  %v938_v15 = vpop.f32.mrb[5].mxu1 }
 0x250   : > { %v1021_v32 = vpop.f32.mrb[25].mxu0  ;;  %v2740_v22 = vpop.eup %2739  ;;  %v1258_v27 = vadd.f32 1.0, %v2738_v37  ;;  %2751 = vpow2.f32 %v1212_v5  ;;  %v3485_v6 = vadd.f32 %v938_v15, %v784_v40  ;;  %v1208_v15 = vmul.f32 1.442695, %v1169_v28 }
 0x251   : > { %v940_v19 = vpop.f32.mrb[6].mxu1  ;;  %v1023_v0 = vpop.f32.mrb[26].mxu0  ;;  %v1259_v34 = vadd.f32 1.0, %v2740_v22  ;;  %2753 = vpow2.f32 %v1206_v8  ;;  %v1174_v62 = vsub.f32 0.0, %v3476_v25  ;;  %v1216_v22 = vmul.f32 1.442695, %v1173_v31 }
 0x252   : > { %v2742_v38 = vpop.eup %2741  ;;  %v942_v11 = vpop.f32.mrb[7].mxu1  ;;  %2755 = vrcp.f32 %v1258_v27  ;;  %v3495_v8 = vadd.f32 %v940_v19, %v787_v44  ;;  %v1175_v49 = vsub.f32 0.0, %v3485_v6  ;;  %v1100_v28 = vadd.f32 %v1019_v16, %v761_v39 }
 0x253   : > { %v1025_v56 = vpop.f32.mrb[27].mxu0  ;;  %v2744_v37 = vpop.eup %2743  ;;  %v1260_v5 = vadd.f32 1.0, %v2742_v38  ;;  %2757 = vrcp.f32 %v1259_v34  ;;  %v3500_v27 = vadd.f32 %v942_v11, %v788_v46  ;;  %v1218_v18 = vmul.f32 1.442695, %v1174_v62 }
 0x254   : > { %v1261_v40 = vadd.f32 1.0, %v2744_v37  ;;  %v1101_v44 = vadd.f32 %v1021_v32, %v762_v43  ;;  %v1176_v46 = vsub.f32 0.0, %v3495_v8  ;;  %v1104_v62 = vadd.f32 %v1023_v0, %v765_v45 }
 0x255   : > { %2759 = vrcp.f32 %v1260_v5  ;;  %v1220_v43 = vmul.f32 1.442695, %v1175_v49  ;;  %v1177_v32 = vsub.f32 0.0, %v3500_v27  ;;  %v4096_v45 = vunpack.c.h.bf16 %v3330_v30 }
 0x256   : > { %2761 = vrcp.f32 %v1261_v40  ;;  %v946_v31 = vpop.f32.mrb[8].mxu1  ;;  %v1029_v19 = vpop.f32.mrb[28].mxu0 }
 0x257   : > { %2763 = vpow2.f32 %v1214_v57  ;;  %v2746_v29 = vpop.eup %2745  ;;  %v3514_v57 = vadd.f32 %v946_v31, %v791_v50  ;;  %v948_v11 = vpop.f32.mrb[9].mxu1  ;;  %v1105_v0 = vadd.f32 %v1025_v56, %v4096_v45  ;;  %v4097_v50 = vunpack.c.h.bf16 %v3337_v35 }
 0x258   : > { %2765 = vpow2.f32 %v1208_v15  ;;  %v1031_v39 = vpop.f32.mrb[29].mxu0  ;;  %v2748_v16 = vpop.eup %2747  ;;  %v1262_v24 = vadd.f32 1.0, %v2746_v29  ;;  %v1222_v56 = vmul.f32 1.442695, %v1176_v46  ;;  %v4099_v35 = vunpack.c.l.bf16 %v3340_v36 }
 0x259   : > { %2767 = vpow2.f32 %v1216_v22  ;;  %v950_v5 = vpop.f32.mrb[10].mxu1  ;;  %v3517_v40 = vpop.f32.mrb[30].mxu0  ;;  %v1266_v37 = vadd.f32 1.0, %v2748_v16  ;;  %v3523_v31 = vadd.f32 %v948_v11, %v4097_v50  ;;  %v1178_v29 = vsub.f32 0.0, %v3514_v57 }
 0x25a   : > { %v2750_v15 = vpop.eup %2749  ;;  %2769 = vpow2.f32 %v1218_v18  ;;  %v952_v34 = vpop.f32.mrb[11].mxu1  ;;  %v3530_v51 = vadd.f32 %v950_v5, %v4098_v23  ;;  %v3534_v11 = vadd.f32 %v1029_v19, %v4099_v35  ;;  %v4100_v50 = vunpack.c.h.bf16 %v3340_v36 }
 0x25b   : > { %v3525_v38 = vpop.f32.mrb[31].mxu0  ;;  %v2752_v22 = vpop.eup %2751  ;;  %2771 = vrcp.f32 %v1262_v24  ;;  %v1263_v49 = vadd.f32 1.0, %v2750_v15  ;;  %v1224_v15 = vmul.f32 1.442695, %v1177_v32  ;;  %v4101_v46 = vunpack.c.h.bf16 %v3347_v41 }
 0x25c   : > { %v2754_v18 = vpop.eup %2753  ;;  %2773 = vrcp.f32 %v1266_v37  ;;  %v1267_v30 = vadd.f32 1.0, %v2752_v22  ;;  %v3536_v45 = vpop.permute.xlu0 %1404  ;;  %v3540_v52 = vadd.f32 %v1031_v39, %v4100_v50  ;;  %v1179_v37 = vsub.f32 0.0, %v3523_v31 }
 0x25d   : > { %v2756_v16 = vpop.eup %2755  ;;  %2775 = vrcp.f32 %v1263_v49  ;;  %v1264_v24 = vadd.f32 1.0, %v2754_v18  ;;  %v3546_v19 = vadd.f32 %v952_v34, %v4101_v46  ;;  %v1226_v49 = vmul.f32 1.442695, %v1178_v29 }
 0x25e   : > { %v2758_v23 = vpop.eup %2757  ;;  %v1322_v5 = vmul.f32 %v2756_v16, %v3366_v54  ;;  %2777 = vrcp.f32 %v1267_v30  ;;  %v1180_v32 = vsub.f32 0.0, %v3530_v51  ;;  %v956_v36 = vpop.f32.mrb[12].mxu1 }
 0x25f   : > { %4102 = vst [vmem:[#allocation24_spill] sm:$0xff] %v3546_v19  ;;  %v2760_v22 = vpop.eup %2759  ;;  %v1323_v35 = vmul.f32 %v2758_v23, %v3374_v60  ;;  %2779 = vrcp.f32 %v1264_v24  ;;  %v1039_v39 = vpop.f32.mrb[32].mxu0  ;;  %v1181_v30 = vsub.f32 0.0, %v3546_v19  ;;  %v4103_v60 = vunpack.c.l.bf16 %v3357_v47 }
 0x260   : > { %v2762_v18 = vpop.eup %2761  ;;  %v1324_v50 = vmul.f32 %v2760_v22, %v3383_v3  ;;  %v1354_v54 = vmul.f32 %v1322_v5, %v1100_v28  ;;  %2781 = vpow2.f32 %v1220_v43  ;;  %v958_v16 = vpop.f32.mrb[13].mxu1  ;;  %v1228_v5 = vmul.f32 1.442695, %v1179_v37 }
 0x261   : > { %v1041_v41 = vpop.f32.mrb[33].mxu0  ;;  %v2764_v34 = vpop.eup %2763  ;;  %v1325_v46 = vmul.f32 %v2762_v18, %v3391_v9  ;;  %v3553_v2 = vmul.f32 %v1323_v35, %v1101_v44  ;;  %2783 = vpow2.f32 %v1222_v56  ;;  %v3557_v29 = vadd.f32 %v956_v36, %v4103_v60 }
 0x262   : > { %v3559_v24 = vpop.f32.mrb[14].mxu1  ;;  %v3561_v23 = vpop.f32.mrb[34].mxu0  ;;  %v1268_v28 = vadd.f32 1.0, %v2764_v34  ;;  %v1356_v43 = vmul.f32 %v1324_v50, %v1104_v62  ;;  %2785 = vpow2.f32 %v1224_v15  ;;  %v1230_v36 = vmul.f32 1.442695, %v1180_v32 }
 0x263   : > { %v2766_v3 = vpop.eup %2765  ;;  %v3563_v22 = vpop.f32.mrb[15].mxu1  ;;  %v3569_v35 = vmul.f32 %v1325_v46, %v1105_v0  ;;  %2787 = vpow2.f32 %v1226_v49  ;;  %v1482_v34 = vmul.f32 %v3536_v45, %v1354_v54  ;;  %v1232_v50 = vmul.f32 1.442695, %v1181_v30 }
 0x264   : > { %v3565_v19 = vpop.f32.mrb[35].mxu0  ;;  %v2768_v9 = vpop.eup %2767  ;;  %v1265_v56 = vadd.f32 1.0, %v2766_v3  ;;  %2789 = vrcp.f32 %v1268_v28  ;;  %v1182_v58 = vsub.f32 0.0, %v3557_v29  ;;  %v4104_v49 = vunpack.c.l.bf16 %v3364_v53 }
 0x265   : > { %v3567_v44 = vpop.permute.xlu0 %1409  ;;  %v2770_v18 = vpop.eup %2769  ;;  %v1269_v60 = vadd.f32 1.0, %v2768_v9 }
 0x266   : > { %v1484_v62 = vmul.f32 %v3567_v44, %v1356_v43  ;;  %v2772_v15 = vpop.eup %2771  ;;  %2791 = vrcp.f32 %v1265_v56  ;;  %v1270_v37 = vadd.f32 1.0, %v2770_v18  ;;  %v1116_v32 = vadd.f32 %v1039_v39, %v4104_v49  ;;  %v966_v9 = vpop.f32.mrb[16].mxu1 }
 0x267   : > { %v2774_v4 = vpop.eup %2773  ;;  %v1326_v3 = vmul.f32 %v2772_v15, %v3416_v55  ;;  %2793 = vrcp.f32 %v1269_v60  ;;  %v1234_v28 = vmul.f32 1.442695, %v1182_v58  ;;  %v4105_v43 = vunpack.c.h.bf16 %v3357_v47  ;;  %v3584_v56 = vpop.f32.mrb[36].mxu0  ;;  %v3598_v47 = vld [vmem:[%s3167_s21 + $0xc8] sm:$0xff] }
 0x268   : > { %v3575_v0 = vpack.c.bf16 %v1484_v62, %v1482_v34  ;;  %v2776_v46 = vpop.eup %2775  ;;  %v1330_v54 = vmul.f32 %v2774_v4, %v3420_v13  ;;  %2795 = vrcp.f32 %v1270_v37  ;;  %v4106_v39 = vunpack.c.l.bf16 %v3350_v42  ;;  %v3593_v13 = vpop.f32.mrb[17].mxu1 }
 0x269   : > { %v3582_v30 = vadd.f32 %v958_v16, %v4105_v43  ;;  %v2778_v55 = vpop.eup %2777  ;;  %v1327_v18 = vmul.f32 %v2776_v46, %v3428_v10  ;;  %v3588_v60 = vmul.f32 %v1326_v3, %v3534_v11  ;;  %2797 = vpow2.f32 %v1228_v5  ;;  %v3595_v58 = vpop.f32.mrb[37].mxu0 }
 0x26a   : > { %v1112_v4 = vadd.f32 %v3517_v40, %v4106_v39  ;;  %v2780_v16 = vpop.eup %2779  ;;  %v1331_v34 = vmul.f32 %v2778_v55, %v3432_v26  ;;  %2799 = vpow2.f32 %v1230_v36  ;;  %v3601_v62 = vmul.f32 %v1330_v54, %v1116_v32  ;;  %v3604_v11 = vpop.f32.mrb[18].mxu1 }
 0x26b   : > { %v1183_v10 = vsub.f32 0.0, %v3582_v30  ;;  %v3606_v5 = vpop.f32.mrb[38].mxu0  ;;  %v2782_v15 = vpop.eup %2781  ;;  %v1328_v40 = vmul.f32 %v2780_v16, %v3439_v20  ;;  %v1359_v37 = vmul.f32 %v1327_v18, %v3540_v52  ;;  %2801 = vpow2.f32 %v1232_v50 }
 0x26c   : > { %v4107_v3 = vunpack.c.h.bf16 %v3364_v53  ;;  %v3612_v46 = vpop.f32.mrb[19].mxu1  ;;  %v3614_v26 = vpop.f32.mrb[39].mxu0  ;;  %v1271_v32 = vadd.f32 1.0, %v2782_v15  ;;  %v4108_v54 = vunpack.c.h.bf16 %v3350_v42  ;;  %2803 = vpow2.f32 %v1234_v28 }
 0x26d   : > { %v2784_v36 = vpop.eup %2783  ;;  %v3622_v52 = vmul.f32 %v3536_v45, %v3553_v2  ;;  %v1415_v39 = vpop.permute.xlu1 %1414  ;;  %v1236_v15 = vmul.f32 1.442695, %v1183_v10  ;;  %v4109_v42 = vunpack.c.l.bf16 %v3372_v59  ;;  %v1485_v2 = vmul.f32 %v3567_v44, %v3569_v35 }
 0x26e   : > { %v1117_v49 = vadd.f32 %v1041_v41, %v4107_v3  ;;  %v1113_v43 = vadd.f32 %v3525_v38, %v4108_v54  ;;  %v2786_v20 = vpop.eup %2785  ;;  %v1272_v53 = vadd.f32 1.0, %v2784_v36  ;;  %v1360_v41 = vmul.f32 %v1328_v40, %v1112_v4  ;;  %v3643_v36 = vpop.f32.mrb[20].mxu1 }
 0x26f   : > { %v2788_v18 = vpop.eup %2787  ;;  %2805 = vrcp.f32 %v1271_v32  ;;  %v1273_v16 = vadd.f32 1.0, %v2786_v20  ;;  %v3629_v38 = vadd.f32 %v3559_v24, %v4109_v42  ;;  %v4110_v4 = vunpack.c.l.bf16 %v3380_v1  ;;  %v3645_v32 = vpop.f32.mrb[40].mxu0 }
 0x270   : > { %v3624_v50 = vmul.f32 %v1331_v34, %v1117_v49  ;;  %v2790_v28 = vpop.eup %2789  ;;  %2807 = vrcp.f32 %v1272_v53  ;;  %v1274_v45 = vadd.f32 1.0, %v2788_v18  ;;  %v4111_v49 = vunpack.c.h.bf16 %v3372_v59  ;;  %v3655_v59 = vpop.f32.mrb[21].mxu1 }
 0x271   : > { %v1120_v34 = vadd.f32 %v3561_v23, %v4110_v4  ;;  %v2792_v40 = vpop.eup %2791  ;;  %v1332_v3 = vmul.f32 %v2790_v28, %v3449_v63  ;;  %2809 = vrcp.f32 %v1273_v16  ;;  %v1184_v10 = vsub.f32 0.0, %v3629_v38 }
 0x272   : > { %v3641_v24 = vadd.f32 %v3563_v22, %v4111_v49  ;;  %v2794_v44 = vpop.eup %2793  ;;  %v1329_v35 = vmul.f32 %v2792_v40, %v3458_v17  ;;  %2811 = vrcp.f32 %v1274_v45  ;;  %v4112_v23 = vunpack.c.h.bf16 %v3380_v1  ;;  %v3657_v22 = vpop.f32.mrb[41].mxu0 }
 0x273   : > { %v4113_v54 = vunpack.c.l.bf16 %v3388_v7  ;;  %v2796_v53 = vpop.eup %2795  ;;  %v1333_v18 = vmul.f32 %v2794_v44, %v3465_v33  ;;  %2813 = vpow2.f32 %v1236_v15  ;;  %v1238_v16 = vmul.f32 1.442695, %v1184_v10  ;;  %v3662_v17 = vpop.f32.mrb[22].mxu1 }
 0x274   : > { %v1121_v63 = vadd.f32 %v3565_v19, %v4112_v23  ;;  %v3660_v42 = vmul.f32 %v1332_v3, %v1120_v34  ;;  %v3664_v1 = vpop.f32.mrb[42].mxu0  ;;  %v2798_v19 = vpop.eup %2797  ;;  %v3667_v28 = vmul.f32 %v1415_v39, %v3588_v60  ;;  %v1185_v45 = vsub.f32 0.0, %v3641_v24 }
 0x275   : > { %v3653_v20 = vadd.f32 %v966_v9, %v4113_v54  ;;  %v3669_v9 = vmul.f32 %v1329_v35, %v1113_v43  ;;  %v3673_v40 = vpop.f32.mrb[23].mxu1  ;;  %v3675_v33 = vpop.f32.mrb[43].mxu0  ;;  %v1334_v3 = vmul.f32 %v2796_v53, %v3476_v25  ;;  %v1275_v49 = vadd.f32 1.0, %v2798_v19 }
 0x276   : > { %v2800_v15 = vpop.eup %2799  ;;  %v1425_v34 = vpop.permute.xlu0 %1424  ;;  %2815 = vpow2.f32 %v1238_v16  ;;  %v3680_v60 = vmul.f32 %v1333_v18, %v1121_v63  ;;  %v3682_v44 = vmul.f32 %v1415_v39, %v1359_v37  ;;  %v1240_v25 = vmul.f32 1.442695, %v1185_v45 }
 0x277   : > { %4114 = vst [vmem:[#allocation25_spill] sm:$0xff] %v3653_v20  ;;  %v1186_v4 = vsub.f32 0.0, %v3653_v20  ;;  %v3678_v10 = vpop.permute.xlu1 %1419  ;;  %v2802_v43 = vpop.eup %2801  ;;  %v1276_v35 = vadd.f32 1.0, %v2800_v15  ;;  %v3688_v54 = vmul.f32 %v1425_v34, %v3601_v62  ;;  %2817 = vrcp.f32 %v1275_v49 }
 0x278   : > { %v3685_v23 = vmul.f32 %v3678_v10, %v1360_v41  ;;  %v2804_v55 = vpop.eup %2803  ;;  %v1277_v20 = vadd.f32 1.0, %v2802_v43  ;;  %v4115_v53 = vunpack.c.l.bf16 %v3396_v12  ;;  %v4116_v37 = vunpack.c.h.bf16 %v3388_v7 }
 0x279   : > { %2819 = vrcp.f32 %v1276_v35  ;;  %v1278_v63 = vadd.f32 1.0, %v2804_v55  ;;  %v1242_v18 = vmul.f32 1.442695, %v1186_v4  ;;  %v2806_v41 = vpop.eup %2805  ;;  %v4117_v19 = vunpack.c.h.bf16 %v3396_v12  ;;  %v3708_v55 = vpop.f32.mrb[44].mxu0  ;;  %v2722_v12 = vld [vmem:[%s4051_s9] sm:$0xff]  }
 0x27a   : > { %v1124_v16 = vadd.f32 %v3584_v56, %v4115_v53  ;;  %v3696_v39 = vadd.f32 %v3593_v13, %v4116_v37  ;;  %2821 = vrcp.f32 %v1277_v20  ;;  %v4118_v15 = vunpack.c.l.bf16 %v3402_v21  ;;  %v2808_v4 = vpop.eup %2807 }
 0x27b   : > { %v1125_v45 = vadd.f32 %v3595_v58, %v4117_v19  ;;  %v1335_v7 = vmul.f32 %v2806_v41, %v3485_v6  ;;  %2823 = vrcp.f32 %v1278_v63  ;;  %v3713_v20 = vpack.c.bf16 %v1485_v2, %v3622_v52  ;;  %v2810_v58 = vpop.eup %2809  ;;  %v2723_v52 = vld [vmem:[%s4051_s9 + $0x48] sm:$0xff]  }
 0x27c   : > { %v3698_v62 = vmul.f32 %v1334_v3, %v1124_v16  ;;  %v3706_v56 = vadd.f32 %v3604_v11, %v4118_v15  ;;  %v1187_v13 = vsub.f32 0.0, %v3696_v39  ;;  %v3715_v3 = vpop.f32.mrb[45].mxu0  ;;  %v1336_v11 = vmul.f32 %v2808_v4, %v3495_v8  ;;  %v2812_v2 = vpop.eup %2811 }
 0x27d   : > { %2825 = vpow2.f32 %v1240_v25  ;;  %v4119_v6 = vunpack.c.l.bf16 %v3408_v61  ;;  %v3725_v35 = vpop.f32.mrb[46].mxu0  ;;  %v1337_v53 = vmul.f32 %v2810_v58, %v3500_v27  ;;  %v1367_v63 = vmul.f32 %v1335_v7, %v1125_v45  ;;  %1722 = vmatprep.mubr.bf16.mxu1 %v3713_v20  ;;  %v2814_v25 = vpop.eup %2813 }
 0x27e   : > { %v1188_v49 = vsub.f32 0.0, %v3706_v56  ;;  %2827 = vpow2.f32 %v1242_v18  ;;  %v1244_v16 = vmul.f32 1.442695, %v1187_v13  ;;  %v3732_v8 = vpop.f32.mrb[47].mxu0  ;;  %v3735_v37 = vmul.f32 %v1425_v34, %v3624_v50  ;;  %1723 = vmatmul.mubr.bf16.vlgmr.msra.gmra.mrb[24].mxu1 %v3575_v0  ;;  %v1430_v27 = vpop.permute.xlu1 %1429  ;;  %v2724_v34 = vld [vmem:[%s4051_s9 + $0x8] sm:$0xff]  }
 0x27f   : > { %v1128_v43 = vadd.f32 %v3606_v5, %v4119_v6  ;;  %v4120_v19 = vunpack.c.h.bf16 %v3402_v21  ;;  %v1338_v18 = vmul.f32 %v2812_v2, %v3514_v57  ;;  %v1279_v45 = vadd.f32 1.0, %v2814_v25  ;;  %2511 = vmatpush3.bf16.msra.mxu1 %v2722_v12  ;;  %v3775_v2 = vpop.f32.mrb[48].mxu0 }
 0x280   : > { %v1246_v5 = vmul.f32 1.442695, %v1188_v49  ;;  %2829 = vpow2.f32 %v1244_v16  ;;  %v4121_v4 = vunpack.c.h.bf16 %v3408_v61  ;;  %v2816_v21 = vpop.eup %2815  ;;  %v4122_v57 = vunpack.c.l.bf16 %v3424_v48  ;;  %2512 = vmatprep.subr.bf16.mxu1 %v2723_v52  ;;  %v2725_v61 = vld [vmem:[%s4051_s9 + $0x50] sm:$0xff]  }
 0x281   : > { %v3737_v41 = vmul.f32 %v1336_v11, %v1128_v43  ;;  %v3742_v15 = vadd.f32 %v3612_v46, %v4120_v19  ;;  %v3753_v46 = vmul.f32 %v1430_v27, %v3660_v42  ;;  %v4123_v58 = vunpack.c.l.bf16 %v3443_v14  ;;  %v2818_v11 = vpop.eup %2817 }
 0x282   : > { %v1129_v50 = vadd.f32 %v3614_v26, %v4121_v4  ;;  %2831 = vpow2.f32 %v1246_v5  ;;  %v3759_v13 = vadd.f32 %v3643_v36, %v4122_v57  ;;  %v1280_v26 = vadd.f32 1.0, %v2816_v21  ;;  %v3788_v5 = vpop.permute.xlu0 %1434  ;;  %v1440_v4 = vpop.permute.xlu1 %1439 }
 0x283   : > { %v1189_v7 = vsub.f32 0.0, %v3742_v15  ;;  %2833 = vrcp.f32 %v1279_v45  ;;  %v1132_v42 = vadd.f32 %v3645_v32, %v4123_v58  ;;  %v1489_v49 = vmul.f32 %v3678_v10, %v3669_v9  ;;  %v2820_v16 = vpop.eup %2819  ;;  %v3783_v10 = vpop.f32.mrb[49].mxu0  ;;  %2513 = vmatpush3.bf16.msra.mxu1 %v2724_v34 }
 0x284   : > { %v1369_v12 = vmul.f32 %v1337_v53, %v1129_v50  ;;  %v1190_v36 = vsub.f32 0.0, %v3759_v13  ;;  %v4124_v43 = vunpack.c.h.bf16 %v3424_v48  ;;  %v1339_v53 = vmul.f32 %v2818_v11, %v3523_v31  ;;  %v2726_v48 = vld [vmem:[%s4051_s9 + $0x10] sm:$0xff]   ;;  %v3792_v45 = vpop.f32.mrb[50].mxu0  ;;  %2514 = vmatprep.subr.bf16.mxu1 %v2725_v61  ;;  %v4128_v11 = vld [vmem:[#allocation21_spill] sm:$0xff] }
 0x285   : > { %v1248_v6 = vmul.f32 1.442695, %v1189_v7  ;;  %2835 = vrcp.f32 %v1280_v26  ;;  %v3778_v25 = vmul.f32 %v1338_v18, %v1132_v42  ;;  %v4125_v32 = vunpack.c.h.bf16 %v3443_v14  ;;  %v2727_v14 = vld [vmem:[%s4051_s9 + $0x58] sm:$0xff]   ;;  %v3808_v26 = vpop.f32.mrb[51].mxu0 }
 0x286   : > { %v3773_v52 = vadd.f32 %v3655_v59, %v4124_v43  ;;  %v2822_v59 = vpop.eup %2821  ;;  %v1340_v19 = vmul.f32 %v2820_v16, %v3530_v51  ;;  %v1250_v31 = vmul.f32 1.442695, %v1190_v36  ;;  %v1493_v50 = vmul.f32 %v1430_v27, %v3680_v60  ;;  %v4126_v51 = vld [vmem:[#allocation20_spill] sm:$0xff] }
 0x287   : > { %v1133_v9 = vadd.f32 %v3657_v22, %v4125_v32  ;;  %2837 = vpow2.f32 %v1248_v6  ;;  %v2824_v22 = vpop.eup %2823  ;;  %v3799_v34 = vmul.f32 %v3788_v5, %v1367_v63  ;;  %v4127_v7 = vunpack.c.l.bf16 %v4126_v51  ;;  %v4130_v63 = vld [vmem:[#allocation24_spill] sm:$0xff]  ;;  %2515 = vmatpush3.bf16.msra.mxu1 %v2726_v48 }
 0x288   : > { %v1191_v18 = vsub.f32 0.0, %v3773_v52  ;;  %v2826_v61 = vpop.eup %2825  ;;  %v1497_v58 = vmul.f32 %v1440_v4, %v1369_v12  ;;  %2839 = vpow2.f32 %v1250_v31  ;;  %v4129_v6 = vunpack.c.l.bf16 %v4128_v11  ;;  %2516 = vmatprep.subr.bf16.mxu1 %v2727_v14 }
 0x289   : > { %v3801_v21 = vmul.f32 %v1339_v53, %v1133_v9  ;;  %v3806_v57 = vadd.f32 %v3662_v17, %v4127_v7  ;;  %v2828_v27 = vpop.eup %2827  ;;  %v1341_v36 = vmul.f32 %v2822_v59, %v4130_v63  ;;  %v1281_v43 = vadd.f32 1.0, %v2826_v61  ;;  %v3839_v7 = vpop.f32.mrb[52].mxu0 }
 0x28a   : > { %v1252_v42 = vmul.f32 1.442695, %v1191_v18  ;;  %v1136_v60 = vadd.f32 %v3664_v1, %v4129_v6  ;;  %v3816_v53 = vpack.c.bf16 %v1489_v49, %v3682_v44  ;;  %v1282_v17 = vadd.f32 1.0, %v2828_v27  ;;  %v2728_v1 = vld [vmem:[%s4051_s9 + $0x18] sm:$0xff]   ;;  %v2830_v59 = vpop.eup %2829  ;;  %v1445_v6 = vpop.permute.xlu0 %1444 }
 0x28b   : > { %v1192_v16 = vsub.f32 0.0, %v3806_v57  ;;  %v4131_v12 = vunpack.c.h.bf16 %v4126_v51  ;;  %v4132_v44 = vunpack.c.h.bf16 %v4128_v11  ;;  %v3832_v48 = vpack.c.bf16 %v3685_v23, %v3667_v28  ;;  %v3845_v23 = vpop.f32.mrb[53].mxu0  ;;  %2517 = vmatpush3.bf16.msra.mxu1 %v2728_v1 }
 0x28c   : > { %2841 = vpow2.f32 %v1252_v42  ;;  %v1372_v32 = vmul.f32 %v1340_v19, %v1136_v60  ;;  %1730 = vmatprep.mubr.bf16.mxu1 %v3816_v53  ;;  %v2832_v19 = vpop.eup %2831  ;;  %v1342_v18 = vmul.f32 %v2824_v22, %v3557_v29  ;;  %v1283_v14 = vadd.f32 1.0, %v2830_v59  ;;  %v1450_v42 = vpop.permute.xlu1 %1449  ;;  %v4133_v60 = vld [vmem:[#allocation22_spill] sm:$0xff] }
 0x28d   : > { %v3821_v9 = vadd.f32 %v3673_v40, %v4131_v12  ;;  %2843 = vrcp.f32 %v1281_v43  ;;  %v1254_v31 = vmul.f32 1.442695, %v1192_v16  ;;  %v1137_v49 = vadd.f32 %v3675_v33, %v4132_v44  ;;  %v2729_v40 = vld [vmem:[%s4051_s9 + $0x60] sm:$0xff]   ;;  %v2834_v61 = vpop.eup %2833  ;;  %1731 = vmatmul.mubr.bf16.gmra.mrb[28].mxu1 %v3832_v48  ;;  %v3851_v43 = vpop.f32.mrb[54].mxu0 }
 0x28e   : > { %2845 = vrcp.f32 %v1282_v17  ;;  %v1284_v33 = vadd.f32 1.0, %v2832_v19  ;;  %v3843_v28 = vpack.c.bf16 %v1493_v50, %v3735_v37  ;;  %v1343_v29 = vmul.f32 %v2834_v61, %v3582_v30  ;;  %v3861_v12 = vpop.f32.mrb[55].mxu0  ;;  %2518 = vmatprep.subr.bf16.mxu1 %v2729_v40 }
 0x28f   : > { %v1193_v51 = vsub.f32 0.0, %v3821_v9  ;;  %2847 = vpow2.f32 %v1254_v31  ;;  %v1373_v11 = vmul.f32 %v1341_v36, %v1137_v49  ;;  %v4134_v27 = vunpack.c.l.bf16 %v4133_v60  ;;  %v2730_v36 = vld [vmem:[%s4051_s9 + $0x20] sm:$0xff]   ;;  %v2836_v37 = vpop.eup %2835 }
 0x290   : > { %2849 = vrcp.f32 %v1283_v14  ;;  %v1496_v50 = vmul.f32 %v1440_v4, %v3737_v41  ;;  %1738 = vmatprep.mubr.bf16.mxu1 %v3843_v28  ;;  %v4135_v30 = vunpack.c.h.bf16 %v4133_v60  ;;  %v1344_v59 = vmul.f32 %v2836_v37, %v3629_v38  ;;  %v4136_v4 = vld [vmem:[#allocation23_spill] sm:$0xff]  ;;  %2519 = vmatpush3.bf16.msra.mxu1 %v2730_v36 }
 0x291   : > { %v1256_v22 = vmul.f32 1.442695, %v1193_v51  ;;  %v1140_v63 = vadd.f32 %v3708_v55, %v4134_v27  ;;  %2851 = vrcp.f32 %v1284_v33  ;;  %v1501_v16 = vmul.f32 %v1450_v42, %v1373_v11  ;;  %v2731_v55 = vld [vmem:[%s4051_s9 + $0x68] sm:$0xff]   ;;  %v2838_v1 = vpop.eup %2837  ;;  %v3881_v33 = vld [vmem:[%s3167_s21 + $0xd8] sm:$0xff] }
 0x292   : > { %v1141_v17 = vadd.f32 %v3715_v3, %v4135_v30  ;;  %v4137_v31 = vunpack.c.l.bf16 %v4136_v4  ;;  %v1285_v49 = vadd.f32 1.0, %v2838_v1  ;;  %v3872_v3 = vpack.c.bf16 %v3753_v46, %v3688_v54  ;;  %v2840_v14 = vpop.eup %2839  ;;  %2520 = vmatprep.subr.bf16.mxu1 %v2731_v55  ;;  %v2732_v46 = vld [vmem:[%s4051_s9 + $0x28] sm:$0xff]  }
 0x293   : > { %2853 = vpow2.f32 %v1256_v22  ;;  %v1374_v41 = vmul.f32 %v1342_v18, %v1140_v63  ;;  %v3875_v40 = vpack.c.bf16 %v1497_v58, %v3799_v34  ;;  %v1494_v51 = vmul.f32 %v3788_v5, %v3698_v62  ;;  %v1455_v62 = vpop.permute.xlu0 %1454  ;;  %v1795_v63 = vld [vmem:[%s3203_s3] sm:$0xf]  ;;  %v4140_v55 = vld [vmem:[#allocation25_spill] sm:$0xff] }
 0x294   : > { %v1144_v44 = vadd.f32 %v3725_v35, %v4137_v31  ;;  %v1375_v19 = vmul.f32 %v1343_v29, %v1141_v17  ;;  %v1499_v38 = vmul.f32 %v1445_v6, %v3801_v21  ;;  %v1500_v18 = vmul.f32 %v1450_v42, %v1372_v32  ;;  %v1460_v35 = vpop.permute.xlu1 %1459  ;;  %v2733_v42 = vld [vmem:[%s4051_s9 + $0x70] sm:$0xff]   ;;  %2521 = vmatpush3.bf16.msra.mxu1 %v2732_v46 }
 0x295   : > { %2855 = vrcp.f32 %v1285_v49  ;;  %v1286_v11 = vadd.f32 1.0, %v2840_v14  ;;  %v810_v54 = vunpack.c.h.bf16 %v3598_v47  ;;  %v1498_v5 = vmul.f32 %v1445_v6, %v3778_v25  ;;  %1739 = vmatmul.mubr.bf16.gmra.mrb[32].mxu1 %v3872_v3  ;;  %2522 = vmatprep.subr.bf16.mxu1 %v2733_v42 }
 0x296   : > { %v1376_v61 = vmul.f32 %v1344_v59, %v1144_v44  ;;  %v2842_v34 = vpop.eup %2841  ;;  %v3888_v58 = vpack.c.bf16 %v1496_v50, %v1494_v51  ;;  %v3890_v32 = vpack.c.bf16 %v1501_v16, %v1499_v38  ;;  %v1502_v60 = vmul.f32 %v1455_v62, %v1374_v41  ;;  %1746 = vmatprep.mubr.bf16.mxu1 %v3875_v40 }
 0x297   : > { %v2844_v29 = vpop.eup %2843  ;;  %2857 = vrcp.f32 %v1286_v11  ;;  %v1287_v22 = vadd.f32 1.0, %v2842_v34  ;;  %v813_v27 = vunpack.c.l.bf16 %v3881_v33  ;;  %v4138_v6 = vunpack.c.h.bf16 %v4136_v4  ;;  %v2735_v4 = vld [vmem:[%s4051_s9 + $0x78] sm:$0xff]   ;;  %2626 = vmatprep.subr.msk.bf16.mxu0 %vm1821_vm1, %v1795_v63 }
 0x298   : > { %v1504_v21 = vmul.f32 %v1460_v35, %v1376_v61  ;;  %v2846_v36 = vpop.eup %2845  ;;  %v1345_v25 = vmul.f32 %v2844_v29, %v3641_v24  ;;  %v4139_v50 = vunpack.c.l.bf16 %v3598_v47  ;;  %v3906_v30 = vpack.c.bf16 %v1500_v18, %v1498_v5  ;;  %v2734_v24 = vld [vmem:[%s4051_s9 + $0x30] sm:$0xff]   ;;  %v756_v18 = vld [vmem:[%s3167_s21 + $0xe8] sm:$0xff]  ;;  %v1470_v42 = vpop.permute.xlu1 %1469 }
 0x299   : > { %v1145_v37 = vadd.f32 %v3732_v8, %v4138_v6  ;;  %v2848_v17 = vpop.eup %2847  ;;  %v1346_v1 = vmul.f32 %v2846_v36, %v4140_v55  ;;  %2859 = vrcp.f32 %v1287_v22  ;;  %v1823_v31 = vsel %vm1821_vm1, %v1795_v63, 0  ;;  %2523 = vmatpush3.bf16.msra.mxu1 %v2734_v24 }
 0x29a   : > { %v1148_v16 = vadd.f32 %v3775_v2, %v4139_v50  ;;  %v3909_v59 = vpack.c.bf16 %v1504_v21, %v1502_v60  ;;  %v2850_v8 = vpop.eup %2849  ;;  %v1288_v41 = vadd.f32 1.0, %v2848_v17  ;;  %v814_v2 = vunpack.c.h.bf16 %v3881_v33  ;;  %2607 = vmatpush3.bf16.msra.mxu0 %v1823_v31  ;;  %2524 = vmatprep.subr.bf16.mxu1 %v2735_v4  ;;  %v1465_v21 = vpop.permute.xlu0 %1464  ;;  %v758_v60 = vld [vmem:[%s3167_s21 + $0xf8] sm:$0xff] }
 0x29b   : > { %v1377_v47 = vmul.f32 %v1345_v25, %v1145_v37  ;;  %v2852_v44 = vpop.eup %2851  ;;  %v1347_v49 = vmul.f32 %v2850_v8, %v3696_v39  ;;  %v1503_v14 = vmul.f32 %v1455_v62, %v1375_v19  ;;  %v1149_v38 = vadd.f32 %v3783_v10, %v810_v54  ;;  %v2736_v39 = vld [vmem:[%s4051_s9 + $0x38] sm:$0xff]  }
 0x29c   : > { %v1378_v51 = vmul.f32 %v1346_v1, %v1148_v16  ;;  %v1348_v11 = vmul.f32 %v2852_v44, %v3706_v56  ;;  %2861 = vrcp.f32 %v1288_v41  ;;  %v1152_v46 = vadd.f32 %v3792_v45, %v813_v27  ;;  %v1480_v4 = vpop.permute.xlu1 %1479 }
 0x29d   : > { %v2854_v61 = vpop.eup %2853  ;;  %v1505_v33 = vmul.f32 %v1460_v35, %v1377_v47  ;;  %v1379_v5 = vmul.f32 %v1347_v49, %v1149_v38  ;;  %v817_v62 = vunpack.c.l.bf16 %v756_v18  ;;  %1747 = vmatmul.mubr.bf16.gmra.mrb[36].mxu1 %v3888_v58  ;;  %v818_v56 = vunpack.c.h.bf16 %v756_v18 }
 0x29e   : > { %v1289_v34 = vadd.f32 1.0, %v2854_v61  ;;  %v1380_v19 = vmul.f32 %v1348_v11, %v1152_v46  ;;  %v1506_v35 = vmul.f32 %v1465_v21, %v1378_v51  ;;  %v1153_v22 = vadd.f32 %v3808_v26, %v814_v2  ;;  %1754 = vmatprep.mubr.bf16.mxu1 %v3890_v32  ;;  %2525 = vmatpush3.bf16.msra.mxu1 %v2736_v39 }
 0x29f   : > { %v1525_v10 = vpack.c.bf16 %v1505_v33, %v1503_v14  ;;  %v2856_v54 = vpop.eup %2855  ;;  %v1156_v25 = vadd.f32 %v3839_v7, %v817_v62  ;;  %v1157_v50 = vadd.f32 %v3845_v23, %v818_v56  ;;  %v821_v16 = vunpack.c.l.bf16 %v758_v60  ;;  %v1475_v23 = vpop.permute.xlu0 %1474 }
 0x2a0   : > { %2863 = vrcp.f32 %v1289_v34  ;;  %v1349_v45 = vmul.f32 %v2856_v54, %v3742_v15  ;;  %v1508_v29 = vmul.f32 %v1470_v42, %v1380_v19  ;;  %v1507_v17 = vmul.f32 %v1465_v21, %v1379_v5 }
 0x2a1   : > { %v2858_v27 = vpop.eup %2857  ;;  %v822_v8 = vunpack.c.h.bf16 %v758_v60 }
 0x2a2   : > { %v1350_v63 = vmul.f32 %v2858_v27, %v3759_v13  ;;  %v1381_v36 = vmul.f32 %v1349_v45, %v1153_v22  ;;  %v1526_v6 = vpack.c.bf16 %v1508_v29, %v1506_v35  ;;  %v1160_v13 = vadd.f32 %v3851_v43, %v821_v16 }
 0x2a3   : > { %v2860_v37 = vpop.eup %2859  ;;  %v1161_v31 = vadd.f32 %v3861_v12, %v822_v8 }
 0x2a4   : > { %v1351_v15 = vmul.f32 %v2860_v37, %v3773_v52  ;;  %v1509_v55 = vmul.f32 %v1470_v42, %v1381_v36  ;;  %v1382_v26 = vmul.f32 %v1350_v63, %v1156_v25 }
 0x2a5   : > { %1755 = vmatmul.mubr.bf16.gmra.mrb[40].mxu1 %v3906_v30 }
 0x2a6   : > { %v2862_v1 = vpop.eup %2861  ;;  %v1383_v24 = vmul.f32 %v1351_v15, %v1157_v50  ;;  %v1527_v41 = vpack.c.bf16 %v1509_v55, %v1507_v17  ;;  %1762 = vmatprep.mubr.bf16.mxu1 %v1525_v10  ;;  %v1510_v44 = vmul.f32 %v1475_v23, %v1382_v26 }
 0x2a7   : > { %v1352_v47 = vmul.f32 %v2862_v1, %v3806_v57 }
 0x2a8   : > { %v1511_v38 = vmul.f32 %v1475_v23, %v1383_v24 }
 0x2a9   : > { %v1384_v2 = vmul.f32 %v1352_v47, %v1160_v13 }
 0x2aa   : > { %v2864_v7 = vpop.eup %2863 }
 0x2ab   : > { %v1353_v52 = vmul.f32 %v2864_v7, %v3821_v9  ;;  %v1512_v49 = vmul.f32 %v1480_v4, %v1384_v2 }
 0x2ad   : > { %v1385_v14 = vmul.f32 %v1353_v52, %v1161_v31  ;;  %v1528_v51 = vpack.c.bf16 %v1512_v49, %v1510_v44  ;;  %1763 = vmatmul.mubr.bf16.gmra.mrb[44].mxu1 %v3909_v59 }
 0x2ae   : > { %1770 = vmatprep.mubr.bf16.mxu1 %v1527_v41 }
 0x2af   : > { %v1513_v18 = vmul.f32 %v1480_v4, %v1385_v14 }
 0x2b1   : > { %v1529_v57 = vpack.c.bf16 %v1513_v18, %v1511_v38 }
 0x2b5   : > { %1771 = vmatmul.mubr.bf16.gmra.mrb[48].mxu1 %v1526_v6 }
 0x2b6   : > { %1778 = vmatprep.mubr.bf16.mxu1 %v1529_v57 }
 0x2bd   : > { %1779 = vmatmul.mubr.bf16.gmra.mrb[52].mxu1 %v1528_v51 }
 0x2be   : > { %2050 = vmatprep.mubr.bf16.mxu1 %v3713_v20 }
 0x2c5   : > { %2051 = vmatmul.mubr.bf16.vlgmr.msra.gmra.mrb[56].mxu1 %v3575_v0 }
 0x2c6   : > { %2058 = vmatprep.mubr.bf16.mxu1 %v3816_v53 }
 0x2cd   : > { %2059 = vmatmul.mubr.bf16.gmra.mrb[60].mxu1 %v3832_v48 }
 0x2ce   : > { %2066 = vmatprep.mubr.bf16.mxu1 %v3843_v28 }
 0x2d5   : > { %2067 = vmatmul.mubr.bf16.gmra.mrb[64].mxu1 %v3872_v3 }
 0x2d6   : > { %2074 = vmatprep.mubr.bf16.mxu1 %v3875_v40 }
 0x2dd   : > { %2075 = vmatmul.mubr.bf16.gmra.mrb[68].mxu1 %v3888_v58 }
 0x2de   : > { %2082 = vmatprep.mubr.bf16.mxu1 %v3890_v32 }
 0x2e5   : > { %2083 = vmatmul.mubr.bf16.gmra.mrb[72].mxu1 %v3906_v30 }
 0x2e6   : > { %2090 = vmatprep.mubr.bf16.mxu1 %v1525_v10 }
 0x2ed   : > { %2091 = vmatmul.mubr.bf16.gmra.mrb[76].mxu1 %v3909_v59 }
 0x2ee   : > { %2098 = vmatprep.mubr.bf16.mxu1 %v1527_v41 }
 0x2f5   : > { %2099 = vmatmul.mubr.bf16.gmra.mrb[80].mxu1 %v1526_v6 }
 0x2f6   : > { %2106 = vmatprep.mubr.bf16.mxu1 %v1529_v57 }
 0x2fd   : > { %2107 = vmatmul.mubr.bf16.gmra.mrb[84].mxu1 %v1528_v51 }
 0x351   : > { %v2453_v0 = vpop.f32.mrb[24].mxu1 }
 0x352   : > { %v2454_v20 = vpop.f32.mrb[25].mxu1 }
 0x353   : > { %v2455_v53 = vadd.f32 %v2454_v20, %v2453_v0  ;;  %v2456_v9 = vpop.f32.mrb[26].mxu1 }
 0x354   : > { %v2457_v48 = vpop.f32.mrb[27].mxu1 }
 0x355   : > { %v2458_v28 = vadd.f32 %v2457_v48, %v2456_v9 }
 0x357   : > { %v1787_v43 = vpack.c.bf16 %v2458_v28, %v2455_v53 }
 0x359   : > { %2608 = vmatprep.mubr.msk.bf16.mxu0 %vm1796_vm2, %v1787_v43 }
 0x360   : > { %v2459_v12 = vpop.f32.mrb[28].mxu1 }
 0x361   : > { %v2460_v3 = vpop.f32.mrb[29].mxu1 }
 0x362   : > { %v2461_v40 = vadd.f32 %v2460_v3, %v2459_v12  ;;  %v2462_v58 = vpop.f32.mrb[30].mxu1 }
 0x363   : > { %v2463_v32 = vpop.f32.mrb[31].mxu1 }
 0x364   : > { %v2464_v30 = vadd.f32 %v2463_v32, %v2462_v58 }
 0x366   : > { %v1788_v59 = vpack.c.bf16 %v2464_v30, %v2461_v40 }
 0x368   : > { %v2465_v61 = vpop.f32.mrb[32].mxu1  ;;  %2609 = vmatmul.mubr.msk.bf16.vlgmr.msra.gmra.mrb[56].mxu0 %vm1796_vm2, %v1788_v59 }
 0x369   : > { %v2466_v11 = vpop.f32.mrb[33].mxu1 }
 0x36a   : > { %v2467_v33 = vadd.f32 %v2466_v11, %v2465_v61  ;;  %v2468_v46 = vpop.f32.mrb[34].mxu1 }
 0x36b   : > { %v2469_v34 = vpop.f32.mrb[35].mxu1 }
 0x36c   : > { %v2470_v5 = vadd.f32 %v2469_v34, %v2468_v46 }
 0x36e   : > { %v1789_v39 = vpack.c.bf16 %v2470_v5, %v2467_v33 }
 0x370   : > { %v2471_v19 = vpop.f32.mrb[36].mxu1  ;;  %2612 = vmatprep.mubr.msk.bf16.mxu0 %vm1796_vm2, %v1789_v39 }
 0x371   : > { %v2472_v62 = vpop.f32.mrb[37].mxu1 }
 0x372   : > { %v2473_v10 = vadd.f32 %v2472_v62, %v2471_v19  ;;  %v2474_v54 = vpop.f32.mrb[38].mxu1 }
 0x373   : > { %v2475_v21 = vpop.f32.mrb[39].mxu1 }
 0x374   : > { %v2476_v42 = vadd.f32 %v2475_v21, %v2474_v54 }
 0x376   : > { %v1790_v56 = vpack.c.bf16 %v2476_v42, %v2473_v10 }
 0x378   : > { %v2477_v45 = vpop.f32.mrb[40].mxu1  ;;  %2613 = vmatmul.mubr.msk.bf16.gmra.mrb[60].mxu0 %vm1796_vm2, %v1790_v56 }
 0x379   : > { %v2478_v35 = vpop.f32.mrb[41].mxu1 }
 0x37a   : > { %v2479_v29 = vadd.f32 %v2478_v35, %v2477_v45  ;;  %v2480_v22 = vpop.f32.mrb[42].mxu1 }
 0x37b   : > { %v2481_v60 = vpop.f32.mrb[43].mxu1 }
 0x37c   : > { %v2482_v27 = vadd.f32 %v2481_v60, %v2480_v22 }
 0x37e   : > { %v1791_v63 = vpack.c.bf16 %v2482_v27, %v2479_v29 }
 0x380   : > { %v2483_v36 = vpop.f32.mrb[44].mxu1  ;;  %2616 = vmatprep.mubr.msk.bf16.mxu0 %vm1796_vm2, %v1791_v63 }
 0x381   : > { %v2484_v25 = vpop.f32.mrb[45].mxu1 }
 0x382   : > { %v2485_v6 = vadd.f32 %v2484_v25, %v2483_v36  ;;  %v2486_v37 = vpop.f32.mrb[46].mxu1 }
 0x383   : > { %v2487_v50 = vpop.f32.mrb[47].mxu1 }
 0x384   : > { %v2488_v16 = vadd.f32 %v2487_v50, %v2486_v37 }
 0x386   : > { %v1792_v15 = vpack.c.bf16 %v2488_v16, %v2485_v6 }
 0x388   : > { %v2489_v17 = vpop.f32.mrb[48].mxu1  ;;  %2617 = vmatmul.mubr.msk.bf16.gmra.mrb[64].mxu0 %vm1796_vm2, %v1792_v15 }
 0x389   : > { %v2490_v55 = vpop.f32.mrb[49].mxu1 }
 0x38a   : > { %v2491_v26 = vadd.f32 %v2490_v55, %v2489_v17  ;;  %v2492_v1 = vpop.f32.mrb[50].mxu1 }
 0x38b   : > { %v2493_v24 = vpop.f32.mrb[51].mxu1 }
 0x38c   : > { %v2494_v8 = vadd.f32 %v2493_v24, %v2492_v1 }
 0x38e   : > { %v1793_v41 = vpack.c.bf16 %v2494_v8, %v2491_v26 }
 0x390   : > { %v2495_v47 = vpop.f32.mrb[52].mxu1  ;;  %2620 = vmatprep.mubr.msk.bf16.mxu0 %vm1796_vm2, %v1793_v41 }
 0x391   : > { %v2496_v13 = vpop.f32.mrb[53].mxu1 }
 0x392   : > { %v2497_v7 = vadd.f32 %v2496_v13, %v2495_v47  ;;  %v2498_v2 = vpop.f32.mrb[54].mxu1 }
 0x393   : > { %v2499_v23 = vpop.f32.mrb[55].mxu1 }
 0x394   : > { %v2500_v4 = vadd.f32 %v2499_v23, %v2498_v2 }
 0x396   : > { %v1794_v52 = vpack.c.bf16 %v2500_v4, %v2497_v7 }
 0x398   : > { %2621 = vmatmul.mubr.msk.bf16.gmra.mrb[68].mxu0 %vm1796_vm2, %v1794_v52  ;;  %v2526_v31 = vpop.f32.mrb[56].mxu1 }
 0x399   : > { %v2527_v44 = vpop.f32.mrb[57].mxu1 }
 0x39a   : > { %v2528_v49 = vadd.f32 %v2527_v44, %v2526_v31  ;;  %v2529_v14 = vpop.f32.mrb[58].mxu1 }
 0x39b   : > { %v2530_v51 = vpop.f32.mrb[59].mxu1 }
 0x39c   : > { %v2531_v38 = vadd.f32 %v2530_v51, %v2529_v14 }
 0x3a0   : > { %v2532_v18 = vpop.f32.mrb[60].mxu1 }
 0x3a1   : > { %v2533_v57 = vpop.f32.mrb[61].mxu1 }
 0x3a2   : > { %v2534_v0 = vadd.f32 %v2533_v57, %v2532_v18  ;;  %v2535_v20 = vpop.f32.mrb[62].mxu1 }
 0x3a3   : > { %v2536_v53 = vpop.f32.mrb[63].mxu1 }
 0x3a4   : > { %v2537_v9 = vadd.f32 %v2536_v53, %v2535_v20 }
 0x3a8   : > { %v2538_v48 = vpop.f32.mrb[64].mxu1 }
 0x3a9   : > { %v2539_v28 = vpop.f32.mrb[65].mxu1 }
 0x3aa   : > { %v2540_v43 = vadd.f32 %v2539_v28, %v2538_v48  ;;  %v2541_v12 = vpop.f32.mrb[66].mxu1 }
 0x3ab   : > { %v2542_v3 = vpop.f32.mrb[67].mxu1 }
 0x3ac   : > { %v2543_v40 = vadd.f32 %v2542_v3, %v2541_v12 }
 0x3b0   : > { %v2544_v58 = vpop.f32.mrb[68].mxu1 }
 0x3b1   : > { %v2545_v32 = vpop.f32.mrb[69].mxu1 }
 0x3b2   : > { %v2546_v30 = vadd.f32 %v2545_v32, %v2544_v58  ;;  %v2547_v59 = vpop.f32.mrb[70].mxu1 }
 0x3b3   : > { %v2548_v61 = vpop.f32.mrb[71].mxu1 }
 0x3b4   : > { %v2549_v11 = vadd.f32 %v2548_v61, %v2547_v59 }
 0x3b8   : > { %v2550_v33 = vpop.f32.mrb[72].mxu1 }
 0x3b9   : > { %v2551_v46 = vpop.f32.mrb[73].mxu1 }
 0x3ba   : > { %v2552_v34 = vadd.f32 %v2551_v46, %v2550_v33  ;;  %v2553_v5 = vpop.f32.mrb[74].mxu1 }
 0x3bb   : > { %v2554_v39 = vpop.f32.mrb[75].mxu1 }
 0x3bc   : > { %v2555_v19 = vadd.f32 %v2554_v39, %v2553_v5 }
 0x3c0   : > { %v2556_v62 = vpop.f32.mrb[76].mxu1 }
 0x3c1   : > { %v2557_v10 = vpop.f32.mrb[77].mxu1 }
 0x3c2   : > { %v2558_v54 = vadd.f32 %v2557_v10, %v2556_v62  ;;  %v2559_v21 = vpop.f32.mrb[78].mxu1 }
 0x3c3   : > { %v2560_v42 = vpop.f32.mrb[79].mxu1 }
 0x3c4   : > { %v2561_v56 = vadd.f32 %v2560_v42, %v2559_v21 }
 0x3c8   : > { %v2562_v45 = vpop.f32.mrb[80].mxu1 }
 0x3c9   : > { %v2563_v35 = vpop.f32.mrb[81].mxu1 }
 0x3ca   : > { %v2564_v29 = vadd.f32 %v2563_v35, %v2562_v45  ;;  %v2565_v22 = vpop.f32.mrb[82].mxu1 }
 0x3cb   : > { %v2566_v60 = vpop.f32.mrb[83].mxu1 }
 0x3cc   : > { %v2567_v27 = vadd.f32 %v2566_v60, %v2565_v22 }
 0x3d0   : > { %v2568_v63 = vpop.f32.mrb[84].mxu1 }
 0x3d1   : > { %v2569_v36 = vpop.f32.mrb[85].mxu1 }
 0x3d2   : > { %v2570_v25 = vadd.f32 %v2569_v36, %v2568_v63  ;;  %v2571_v6 = vpop.f32.mrb[86].mxu1 }
 0x3d3   : > { %v2572_v37 = vpop.f32.mrb[87].mxu1 }
 0x3d4   : > { %v2573_v50 = vadd.f32 %v2572_v37, %v2571_v6 }
 0x43b   : > { %v2610_v16 = vpop.f32.mrb[56].mxu0 }
 0x43c   : > { %v2061_v15 = vadd.f32 %v2610_v16, %v2534_v0  ;;  %v1859_v17 = vpop.f32.mrb[57].mxu0 }
 0x43d   : > { %v2053_v55 = vadd.f32 %v2528_v49, %v1859_v17  ;;  %v2611_v26 = vpop.f32.mrb[58].mxu0 }
 0x43e   : > { %2117 = vst [vmem:[%s3212_s17 + $0x10] sm:$0xff] %v2061_v15  ;;  %v2064_v1 = vadd.f32 %v2611_v26, %v2537_v9  ;;  %v1862_v24 = vpop.f32.mrb[59].mxu0 }
 0x43f   : > { %2115 = vst [vmem:[%s3212_s17] sm:$0xff] %v2053_v55  ;;  %v2056_v8 = vadd.f32 %v2531_v38, %v1862_v24 }
 0x440   : > { %2118 = vst [vmem:[%s3212_s17 + $0x18] sm:$0xff] %v2064_v1 }
 0x441   : > { %2116 = vst [vmem:[%s3212_s17 + $0x8] sm:$0xff] %v2056_v8 }
 0x44b   : > { %v2614_v41 = vpop.f32.mrb[60].mxu0 }
 0x44c   : > { %v2077_v47 = vadd.f32 %v2614_v41, %v2546_v30  ;;  %v1875_v13 = vpop.f32.mrb[61].mxu0 }
 0x44d   : > { %v2069_v7 = vadd.f32 %v2540_v43, %v1875_v13  ;;  %v2615_v2 = vpop.f32.mrb[62].mxu0 }
 0x44e   : > { %2121 = vst [vmem:[%s3212_s17 + $0x30] sm:$0xff] %v2077_v47  ;;  %v2080_v23 = vadd.f32 %v2615_v2, %v2549_v11  ;;  %v1878_v4 = vpop.f32.mrb[63].mxu0 }
 0x44f   : > { %2119 = vst [vmem:[%s3212_s17 + $0x20] sm:$0xff] %v2069_v7  ;;  %v2072_v52 = vadd.f32 %v2543_v40, %v1878_v4 }
 0x450   : > { %2122 = vst [vmem:[%s3212_s17 + $0x38] sm:$0xff] %v2080_v23 }
 0x451   : > { %2120 = vst [vmem:[%s3212_s17 + $0x28] sm:$0xff] %v2072_v52 }
 0x45b   : > { %v2618_v31 = vpop.f32.mrb[64].mxu0 }
 0x45c   : > { %v2093_v44 = vadd.f32 %v2618_v31, %v2558_v54  ;;  %v1891_v49 = vpop.f32.mrb[65].mxu0 }
 0x45d   : > { %v2085_v14 = vadd.f32 %v2552_v34, %v1891_v49  ;;  %v2619_v51 = vpop.f32.mrb[66].mxu0 }
 0x45e   : > { %2125 = vst [vmem:[%s3212_s17 + $0x50] sm:$0xff] %v2093_v44  ;;  %v2096_v38 = vadd.f32 %v2619_v51, %v2561_v56  ;;  %v1894_v18 = vpop.f32.mrb[67].mxu0 }
 0x45f   : > { %2123 = vst [vmem:[%s3212_s17 + $0x40] sm:$0xff] %v2085_v14  ;;  %v2088_v57 = vadd.f32 %v2555_v19, %v1894_v18 }
 0x460   : > { %2126 = vst [vmem:[%s3212_s17 + $0x58] sm:$0xff] %v2096_v38 }
 0x461   : > { %2124 = vst [vmem:[%s3212_s17 + $0x48] sm:$0xff] %v2088_v57 }
 0x46b   : > { %v2622_v0 = vpop.f32.mrb[68].mxu0 }
 0x46c   : > { %v2109_v20 = vadd.f32 %v2622_v0, %v2570_v25  ;;  %v1907_v53 = vpop.f32.mrb[69].mxu0 }
 0x46d   : > { %v2101_v9 = vadd.f32 %v2564_v29, %v1907_v53  ;;  %v2623_v48 = vpop.f32.mrb[70].mxu0 }
 0x46e   : > { %2129 = vst [vmem:[%s3212_s17 + $0x70] sm:$0xff] %v2109_v20  ;;  %v2112_v28 = vadd.f32 %v2623_v48, %v2573_v50  ;;  %v1910_v43 = vpop.f32.mrb[71].mxu0 }
 0x46f   : > { %2127 = vst [vmem:[%s3212_s17 + $0x60] sm:$0xff] %v2101_v9  ;;  %v2104_v12 = vadd.f32 %v2567_v27, %v1910_v43 }
 0x470   : > { %2130 = vst [vmem:[%s3212_s17 + $0x78] sm:$0xff] %v2112_v28 }
 0x471   : > { %2128 = vst [vmem:[%s3212_s17 + $0x68] sm:$0xff] %v2104_v12 }
 0x472 PF: > { %s2131_s21 = sld [smem:[#allocation4 + %s3081_s25]] }
 0x478   : > { %p2409_p9 = scmp.ne.s32.totalorder %s2131_s21, 0 }
 0x479   : > { %v2995_v3 = vmov (!%p2409_p9), 0.0  }
 0x47a   : > { %2135 = sbr.rel (%p2409_p9) target bundleno = 1154 (0x482), region = 64  ;;  %2136 = vst [vmem:[%s3212_s17] sm:$0xff] (!%p2409_p9), %v2995_v3  ;;  %2137 = vst [vmem:[%s3212_s17 + $0x8] sm:$0xff] (!%p2409_p9), %v2995_v3 }
 0x47b   : > { %2138 = vst [vmem:[%s3212_s17 + $0x10] sm:$0xff] (!%p2409_p9), %v2995_v3  ;;  %2139 = vst [vmem:[%s3212_s17 + $0x18] sm:$0xff] (!%p2409_p9), %v2995_v3 }
 0x47c   : > { %2140 = vst [vmem:[%s3212_s17 + $0x20] sm:$0xff] (!%p2409_p9), %v2995_v3  ;;  %2141 = vst [vmem:[%s3212_s17 + $0x28] sm:$0xff] (!%p2409_p9), %v2995_v3 }
 0x47d   : > { %2142 = vst [vmem:[%s3212_s17 + $0x30] sm:$0xff] (!%p2409_p9), %v2995_v3  ;;  %2143 = vst [vmem:[%s3212_s17 + $0x38] sm:$0xff] (!%p2409_p9), %v2995_v3 }
 0x47e   : > { %2144 = vst [vmem:[%s3212_s17 + $0x40] sm:$0xff] (!%p2409_p9), %v2995_v3  ;;  %2145 = vst [vmem:[%s3212_s17 + $0x48] sm:$0xff] (!%p2409_p9), %v2995_v3 }
 0x47f   : > { %2146 = vst [vmem:[%s3212_s17 + $0x50] sm:$0xff] (!%p2409_p9), %v2995_v3  ;;  %2147 = vst [vmem:[%s3212_s17 + $0x58] sm:$0xff] (!%p2409_p9), %v2995_v3 }
 0x480   : > { %2148 = vst [vmem:[%s3212_s17 + $0x60] sm:$0xff] (!%p2409_p9), %v2995_v3  ;;  %2149 = vst [vmem:[%s3212_s17 + $0x68] sm:$0xff] (!%p2409_p9), %v2995_v3 }
 0x481   : > { %2150 = vst [vmem:[%s3212_s17 + $0x70] sm:$0xff] %v2995_v3  ;;  %2151 = vst [vmem:[%s3212_s17 + $0x78] sm:$0xff] %v2995_v3 }
 0x482 PF: > { %s4141_s28 = sld [smem:[#allocation18_spill]]  ;;  %s2420_s19 = sshll.u32 %s3081_s25, 11 }
 0x483   : > { %s4142_s30 = sld [smem:[#allocation27_spill]]  ;;  %s2166_s14 = sshll.u32 %s3212_s17, 4  ;;  %s4000_s14 = int_to_ptr.vmem [resolvable:$true] %s2166_s14 }
 0x484   : > { %s2153_s10 = scalar_lea.sflag [#allocation7], %s3163_s18  ;;  %s2919_s1 = scalar_lea.vmem %s4000_s14, 2048 }
 0x485   : > { %p2920_p11 = scmp.ne.s32.totalorder %s4000_s14, %s2919_s1  ;;  %s2996_s22 = smov [#allocation8]  }
 0x486   : > { %s2923_s24 = sshll.u32 %s2996_s22, 4  ;;  %s2924_s24 = int_to_ptr.vmem [resolvable:$false] %s2923_s24 }
 0x487   : > { %s2925_s25 = scalar_lea.vmem %s2924_s24, 4096  ;;  %p2926_p10 = scmp.lt.s32.totalorder %s4000_s14, %s2924_s24 }
 0x488   : > { %p4143_p13 = scmp.ne.s32.totalorder %s4141_s28, 0  ;;  %p2927_p12 = scmp.lt.s32.totalorder %s2925_s25, %s2919_s1 }
 0x489   : > { %s3997_s27 = scalar_lea.hbm %s4142_s30, %s2420_s19 }
 0x48a   : > { %p2921_p0 = pnand %p2920_p11, %p4143_p13  ;;  %p2928_p3 = por %p2927_p12, %p2926_p10 }
 0x48c   : > { %p2922_p1 = pneg %p2921_p0 }
 0x48e   : > { %p2929_p6 = pnand %p2928_p3, %p2922_p1 }
 0x490   : > { %2932 = shalt.err (!%p2929_p6)
}
 0x491   : > { %s2933_s17 = scalar_lea.hbm %s3997_s27, 2048  ;;  %s2937_s0 = scalar_lea.hbm %s4142_s30, 16384 }
 0x492   : > { %p2934_p7 = scmp.ne.s32.totalorder %s3997_s27, %s2933_s17  ;;  %p2938_p2 = scmp.lt.u32.totalorder %s3997_s27, %s4142_s30 }
 0x493   : > { %p2939_p5 = scmp.lt.u32.totalorder %s2937_s0, %s2933_s17  ;;  %p2941_p11 = scmp.lt.u32.totalorder %s2933_s17, %s3997_s27 }
 0x494   : > { %p2935_p8 = pnand %p2934_p7, %p4143_p13 }
 0x495   : > { %p2940_p9 = por %p2939_p5, %p2938_p2 }
 0x496   : > { %p2936_p4 = pneg %p2935_p8 }
 0x497   : > { %p2942_p0 = por %p2941_p11, %p2940_p9 }
 0x499   : > { %p2943_p1 = pnand %p2942_p0, %p2936_p4 }
 0x49b   : > { %2946 = shalt.err (!%p2943_p1)
}
 0x49c   : > { %s2997_s11 = smov 128   ;;  %s2998_s29 = smov 8  }
 0x49d   : > { %2629 = dma.vmem_to_hbm [thread:$0]  (%p4143_p13), %s4000_s14, 2048, %s3997_s27, %s2153_s10, %s2997_s11, %s2997_s11, %s2998_s29  }
 0x49e PF: > { %s4144_s26 = sld [smem:[#allocation15_spill]]  ;;  %s4145_s12 = sld [smem:[#allocation12_spill]] }
 0x49f   : > { %s4146_s21 = sld [smem:[#allocation19_spill]] }
 0x4a4   : > { %p2640_p10 = scmp.ge.s32.totalorder %s4144_s26, 2  ;;  %s2181_s19 = sand.u32 1, %s4145_s12  }
 0x4a5   : > { %p4147_p12 = scmp.ne.s32.totalorder %s4146_s21, 0  ;;  %s2182_s15 = scalar_lea.sflag [#allocation7], %s2181_s19 }
 0x4a7   : > { %p2636_p3 = pnand %p2640_p10, %p4147_p12 }
 0x4a9   : > { %2970 = dma.done.wait (!%p2636_p3), %s2182_s15, 2048  }
 0x4aa   : > { %2972 = vsyncadd (!%p2636_p3), %s2182_s15, 4294965248  ;;  %s4148_s24 = sld [smem:[#allocation16_spill]]  ;;  %s4149_s1 = sld [smem:[#allocation13_spill]] }
 0x4ab   : > { %s4150_s22 = sld [smem:[#allocation14_spill]]  ;;  %s4151_s23 = sld [smem:[#allocation17_spill]] }
 0x4b0   : > { %p33_p6 = scmp.ge.s32.totalorder %s4148_s24, 10  }
 0x4b2   :  { %35 = sbr.rel (!%p33_p6) target bundleno = 31 (0x1f), region = 123 }
 0x4b9   :  { %2187 = vsyncpa [#allocation6], 1 }
 0x4ba   :  { %2189 = vsyncpa [#allocation6 + $0x1], 1 }
 0x4bb   :  { %2190 = vsyncpa [#allocation7], 1 }
 0x4bc   :  { %2192 = vsyncpa [#allocation7 + $0x1], 1 }

</bundles_post_ra>
